<compile_context>
chip_gen: v7x
topology: tpu7x:2x2x1
jax: 0.10.0
libtpu: 0.0.40
codegen_flags: <defaults>
</compile_context>

<pallas_src>
import jax
import jax.numpy as jnp
import numpy as np
from jax.experimental import pallas as pl
from jax.experimental.pallas import tpu as pltpu

HID = (64, 128, 256, 512)  # fixed hidden widths of the ChannelDecoder MLP


def _make_decoder_kernel(cb):
    """Kernel over (channel_block, d_tile) grid; cb channels per step."""

    def kernel(z_ref, w03_ref, w4_ref, recon_ref, sig_ref):
        z = z_ref[...]
        for i in range(cb):
            # bf16 on the wire (halves the dominant HBM stream); f32 on the MXU.
            w4 = w4_ref[i].astype(jnp.float32)
            sig = jnp.maximum(
                jnp.dot(w03_ref[i], w4, preferred_element_type=jnp.float32),
                0.0)                                              # F.relu
            sig_ref[i] = sig.astype(sig_ref.dtype)
            recon_ref[i] = jnp.dot(
                z, sig, preferred_element_type=jnp.float32
            ).astype(recon_ref.dtype)

    return kernel


def multi_channel_decoder_fwd(z, w0, w1, w2, w3, w4, *, td=None,
                              channel_major=False, w4_dtype=jnp.bfloat16):
    """
    z  : (B, L)       latent input
    w0 : (C, L, 64)   stacked per-channel decoder[0].weight.T
    w1 : (C, 64, 128)
    w2 : (C, 128, 256)
    w3 : (C, 256, 512)
    w4 : (C, 512, D)
    returns (stacked_recon, stacked_sig):
      PyTorch layout (B, D, C), (L, D, C)     if channel_major=False
      channel-major  (C, B, D), (C, L, D)     if channel_major=True (no extra
                                              HBM round trip / transpose)
    """
    B, L = z.shape
    C = w0.shape[0]
    D = w4.shape[-1]

    # D-independent chain hoisted into plain JAX: only (C, L, 512), so it is
    # negligible work and removes the in-kernel scratch dependency.
    w03 = (w0 @ w1 @ w2 @ w3).astype(jnp.float32)

    # Dominant HBM stream in bf16 (accumulation stays f32 inside the kernel).
    if w4.dtype != w4_dtype:
        w4 = w4.astype(w4_dtype)
    z = z.astype(jnp.float32)

    # Channel blocking: amortize per-step overhead; both grid axes are
    # parallel so megacore balance does not depend on C // cb alone.
    cb = 2 if C % 2 == 0 else 1

    # D tiling without padding: balanced, 128-aligned tiles; the (possibly
    # partial) last tile is masked by Pallas — no jnp.pad of W4, no reslice.
    if td is None:
        td = 4096
    if td >= D:
        td = D
        n_d = 1
    else:
        n_d = pl.cdiv(D, td)
        td = ((pl.cdiv(D, n_d) + 127) // 128) * 128
        n_d = pl.cdiv(D, td)

    grid = (C // cb, n_d)

    # Explicit scoped-VMEM budget: double-buffered per-step footprint plus
    # headroom; above the 16/32 MiB defaults on v5e/v6e, comfortably under
    # v7x's 64 MiB physical VMEM at the default cb=2, td=4096.
    w4_itemsize = jnp.dtype(w4_dtype).itemsize
    step_bytes = (cb * HID[3] * td * w4_itemsize      # W4 tile
                  + cb * B * td * 4                   # recon tile
                  + cb * L * td * 4                   # sig tile
                  + cb * L * HID[3] * 4               # W03 block
                  + B * L * 4)                        # z
    vmem_limit = int(max(32 * 1024 * 1024, 2 * step_bytes + 8 * 1024 * 1024))

    recon_cbd, sig_cld = pl.pallas_call(
        _make_decoder_kernel(cb),
        out_shape=(
            jax.ShapeDtypeStruct((C, B, D), jnp.float32),
            jax.ShapeDtypeStruct((C, L, D), jnp.float32),
        ),
        grid_spec=pltpu.PrefetchScalarGridSpec(
            num_scalar_prefetch=0,
            grid=grid,
            in_specs=[
                pl.BlockSpec((B, L), lambda c, d: (0, 0)),               # z
                pl.BlockSpec((cb, L, HID[3]), lambda c, d: (c, 0, 0)),   # W03
                pl.BlockSpec((cb, HID[3], td), lambda c, d: (c, 0, d)),  # W4
            ],
            out_specs=[
                pl.BlockSpec((cb, B, td), lambda c, d: (c, 0, d)),   # recon
                pl.BlockSpec((cb, L, td), lambda c, d: (c, 0, d)),   # sig
            ],
        ),
        compiler_params=pltpu.CompilerParams(
            # No cross-iteration state left in the kernel -> both axes can be
            # split across TensorCores (fine-grained balance on v7x).
            dimension_semantics=("parallel", "parallel"),
            vmem_limit_bytes=vmem_limit,
        ),
    )(z, w03, w4)

    if channel_major:
        return recon_cbd, sig_cld

    # PyTorch layout: stack along dim=2 (channel last).  This costs one extra
    # HBM round trip of both outputs (lane-sparse last dim, C << 128); pass
    # channel_major=True if the consumer can take (C, B, D)/(C, L, D).
    stacked_recon = jnp.transpose(recon_cbd, (1, 2, 0))   # (B, D, C)
    stacked_sig = jnp.transpose(sig_cld, (1, 2, 0))        # (L, D, C)
    return stacked_recon, stacked_sig


def init_params(key, input_dim, channels, output_dim):
    """Deterministic synthetic init of the stacked per-channel weights.

    PyTorch: ChannelDecoder(output_dim, input_dim) => Linear chain
    output_dim -> 64 -> 128 -> 256 -> 512 -> input_dim (all bias=False).
    We store weight.T directly, stacked over channels."""
    L, D, C = output_dim, input_dim, channels
    dims = (L,) + HID + (D,)
    keys = jax.random.split(key, len(dims))  # one key per layer
    ws = []
    for i in range(len(dims) - 1):
        fan_in = dims[i]
        scale = 1.0 / np.sqrt(fan_in)
        ws.append(jax.random.uniform(
            keys[i], (C, dims[i], dims[i + 1]),
            minval=-scale, maxval=scale, dtype=jnp.float32))
    # decompressor (Linear(1, channels, bias=False)) — unused in forward.
    decompressor_w = jax.random.uniform(keys[-1], (C, 1),
                                        minval=-1.0, maxval=1.0,
                                        dtype=jnp.float32)
    return ws, decompressor_w


def reference_fwd(z, ws):
    """Pure-JAX reference mirroring the PyTorch forward (f32 weights)."""
    w0, w1, w2, w3, w4 = ws
    recons, sigs = [], []
    C = w0.shape[0]
    for c in range(C):
        s = jnp.maximum(w0[c] @ w1[c] @ w2[c] @ w3[c] @ w4[c], 0.0)
        sigs.append(s)
        recons.append(z @ s)
    return jnp.stack(recons, axis=2), jnp.stack(sigs, axis=2)


if __name__ == "__main__":
    # Tighter host-side matmuls so the only material kernel/reference delta is
    # the bf16 cast of W4 (abs error ~1e-4 at these magnitudes).
    jax.config.update("jax_default_matmul_precision", "highest")

    # Small shapes consistent with the module:
    #   input_dim D = 16 (data dim), channels C = 4, output_dim L = 8 (latent),
    #   batch B = 2.  z has shape (B, output_dim) = (2, 8).
    B, L, D, C = 2, 8, 16, 4

    key = jax.random.PRNGKey(0)
    k_z, k_w = jax.random.split(key)
    z = jax.random.normal(k_z, (B, L), dtype=jnp.float32)
    (w0, w1, w2, w3, w4), _decomp_w = init_params(k_w, D, C, L)

    recon, sig = multi_channel_decoder_fwd(z, w0, w1, w2, w3, w4)
    recon = jax.block_until_ready(recon)
    sig = jax.block_until_ready(sig)

    assert recon.shape == (B, D, C) and sig.shape == (L, D, C)

    recon_ref, sig_ref = reference_fwd(z, (w0, w1, w2, w3, w4))
    # bf16 W4 on the wire (f32 accumulation): loose-but-safe tolerances.
    np.testing.assert_allclose(np.asarray(recon), np.asarray(recon_ref),
                               rtol=5e-2, atol=5e-3)
    np.testing.assert_allclose(np.asarray(sig), np.asarray(sig_ref),
                               rtol=5e-2, atol=5e-3)

    print("KERNEL_OK")
</pallas_src>

<mosaic_0001>
module attributes {stable_mosaic.version = 11 : i64} {
  func.func @kernel(%arg0: i32, %arg1: i32, %arg2: memref<2x8xf32, #tpu.memory_space<vmem>>, %arg3: memref<2x8x512xf32, #tpu.memory_space<vmem>>, %arg4: memref<2x512x16xbf16, #tpu.memory_space<vmem>>, %arg5: memref<2x2x16xf32, #tpu.memory_space<vmem>>, %arg6: memref<2x8x16xf32, #tpu.memory_space<vmem>>) attributes {dimension_semantics = [#tpu.dimension_semantics<parallel>, #tpu.dimension_semantics<parallel>], iteration_bounds = array<i64: 2, 1>, scalar_prefetch = 0 : i64, scratch_operands = 0 : i64, tpu.core_type = #tpu.core_type<tc>, window_params = [{pipeline_mode = #tpu.pipeline_mode<synchronous>, transform_indices = @transform_0, window_bounds = array<i64: 2, 8>}, {transform_indices = @transform_1, window_bounds = array<i64: 2, 8, 512>}, {transform_indices = @transform_2, window_bounds = array<i64: 2, 512, 16>}, {transform_indices = @transform_3, window_bounds = array<i64: 2, 2, 16>}, {transform_indices = @transform_4, window_bounds = array<i64: 2, 8, 16>}]} {
    %c0 = arith.constant 0 : index
    %c0_0 = arith.constant 0 : index
    %0 = vector.load %arg2[%c0, %c0_0] : memref<2x8xf32, #tpu.memory_space<vmem>>, vector<2x8xf32>
    %c0_1 = arith.constant 0 : index
    %c0_2 = arith.constant 0 : index
    %c0_3 = arith.constant 0 : index
    %1 = vector.load %arg4[%c0_1, %c0_2, %c0_3] : memref<2x512x16xbf16, #tpu.memory_space<vmem>>, vector<1x512x16xbf16>
    %2 = vector.shape_cast %1 : vector<1x512x16xbf16> to vector<512x16xbf16>
    %3 = arith.extf %2 : vector<512x16xbf16> to vector<512x16xf32>
    %c0_4 = arith.constant 0 : index
    %c0_5 = arith.constant 0 : index
    %c0_6 = arith.constant 0 : index
    %4 = vector.load %arg3[%c0_4, %c0_5, %c0_6] : memref<2x8x512xf32, #tpu.memory_space<vmem>>, vector<1x8x512xf32>
    %5 = vector.shape_cast %4 : vector<1x8x512xf32> to vector<8x512xf32>
    %cst = arith.constant dense<0.000000e+00> : vector<8x16xf32>
    %6 = tpu.matmul %5, %3, %cst {dimension_numbers = #tpu.dot_dimension_numbers<[1], [0], [0], [1], [0, 0, 1, 1], [], []>, precision = #tpu.contract_precision<fp32>} : vector<8x512xf32>, vector<512x16xf32>, vector<8x16xf32> -> vector<8x16xf32>
    %cst_7 = arith.constant 0.000000e+00 : f32
    %7 = vector.broadcast %cst_7 : f32 to vector<8x16xf32>
    %8 = arith.maximumf %6, %7 : vector<8x16xf32>
    %c0_8 = arith.constant 0 : index
    %c0_9 = arith.constant 0 : index
    %c0_10 = arith.constant 0 : index
    %9 = vector.load %arg6[%c0_8, %c0_9, %c0_10] : memref<2x8x16xf32, #tpu.memory_space<vmem>>, vector<1x8x16xf32>
    %10 = vector.shape_cast %9 : vector<1x8x16xf32> to vector<8x16xf32>
    %11 = vector.shape_cast %8 : vector<8x16xf32> to vector<1x8x16xf32>
    tpu.vector_store %arg6[%c0_8, %c0_9, %c0_10], %11 {strides = array<i32>} : memref<2x8x16xf32, #tpu.memory_space<vmem>>, vector<1x8x16xf32>,
    %cst_11 = arith.constant dense<0.000000e+00> : vector<2x16xf32>
    %12 = tpu.matmul %0, %8, %cst_11 {dimension_numbers = #tpu.dot_dimension_numbers<[1], [0], [0], [1], [0, 0, 1, 1], [], []>, precision = #tpu.contract_precision<fp32>} : vector<2x8xf32>, vector<8x16xf32>, vector<2x16xf32> -> vector<2x16xf32>
    %c0_12 = arith.constant 0 : index
    %c0_13 = arith.constant 0 : index
    %c0_14 = arith.constant 0 : index
    %13 = vector.load %arg5[%c0_12, %c0_13, %c0_14] : memref<2x2x16xf32, #tpu.memory_space<vmem>>, vector<1x2x16xf32>
    %14 = vector.shape_cast %13 : vector<1x2x16xf32> to vector<2x16xf32>
    %15 = vector.shape_cast %12 : vector<2x16xf32> to vector<1x2x16xf32>
    tpu.vector_store %arg5[%c0_12, %c0_13, %c0_14], %15 {strides = array<i32>} : memref<2x2x16xf32, #tpu.memory_space<vmem>>, vector<1x2x16xf32>,
    %c1 = arith.constant 1 : index
    %c0_15 = arith.constant 0 : index
    %c0_16 = arith.constant 0 : index
    %16 = vector.load %arg4[%c1, %c0_15, %c0_16] : memref<2x512x16xbf16, #tpu.memory_space<vmem>>, vector<1x512x16xbf16>
    %17 = vector.shape_cast %16 : vector<1x512x16xbf16> to vector<512x16xbf16>
    %18 = arith.extf %17 : vector<512x16xbf16> to vector<512x16xf32>
    %c1_17 = arith.constant 1 : index
    %c0_18 = arith.constant 0 : index
    %c0_19 = arith.constant 0 : index
    %19 = vector.load %arg3[%c1_17, %c0_18, %c0_19] : memref<2x8x512xf32, #tpu.memory_space<vmem>>, vector<1x8x512xf32>
    %20 = vector.shape_cast %19 : vector<1x8x512xf32> to vector<8x512xf32>
    %cst_20 = arith.constant dense<0.000000e+00> : vector<8x16xf32>
    %21 = tpu.matmul %20, %18, %cst_20 {dimension_numbers = #tpu.dot_dimension_numbers<[1], [0], [0], [1], [0, 0, 1, 1], [], []>, precision = #tpu.contract_precision<fp32>} : vector<8x512xf32>, vector<512x16xf32>, vector<8x16xf32> -> vector<8x16xf32>
    %cst_21 = arith.constant 0.000000e+00 : f32
    %22 = vector.broadcast %cst_21 : f32 to vector<8x16xf32>
    %23 = arith.maximumf %21, %22 : vector<8x16xf32>
    %c1_22 = arith.constant 1 : index
    %c0_23 = arith.constant 0 : index
    %c0_24 = arith.constant 0 : index
    %24 = vector.load %arg6[%c1_22, %c0_23, %c0_24] : memref<2x8x16xf32, #tpu.memory_space<vmem>>, vector<1x8x16xf32>
    %25 = vector.shape_cast %24 : vector<1x8x16xf32> to vector<8x16xf32>
    %26 = vector.shape_cast %23 : vector<8x16xf32> to vector<1x8x16xf32>
    tpu.vector_store %arg6[%c1_22, %c0_23, %c0_24], %26 {strides = array<i32>} : memref<2x8x16xf32, #tpu.memory_space<vmem>>, vector<1x8x16xf32>,
    %cst_25 = arith.constant dense<0.000000e+00> : vector<2x16xf32>
    %27 = tpu.matmul %0, %23, %cst_25 {dimension_numbers = #tpu.dot_dimension_numbers<[1], [0], [0], [1], [0, 0, 1, 1], [], []>, precision = #tpu.contract_precision<fp32>} : vector<2x8xf32>, vector<8x16xf32>, vector<2x16xf32> -> vector<2x16xf32>
    %c1_26 = arith.constant 1 : index
    %c0_27 = arith.constant 0 : index
    %c0_28 = arith.constant 0 : index
    %28 = vector.load %arg5[%c1_26, %c0_27, %c0_28] : memref<2x2x16xf32, #tpu.memory_space<vmem>>, vector<1x2x16xf32>
    %29 = vector.shape_cast %28 : vector<1x2x16xf32> to vector<2x16xf32>
    %30 = vector.shape_cast %27 : vector<2x16xf32> to vector<1x2x16xf32>
    tpu.vector_store %arg5[%c1_26, %c0_27, %c0_28], %30 {strides = array<i32>} : memref<2x2x16xf32, #tpu.memory_space<vmem>>, vector<1x2x16xf32>,
    return
  }
  func.func @transform_0(%arg0: i32, %arg1: i32) -> (i32, i32) {
    %c0_i32 = arith.constant 0 : i32
    %c0_i32_0 = arith.constant 0 : i32
    %c0_i32_1 = arith.constant 0 : i32
    return %c0_i32, %c0_i32_0 : i32, i32
  }
  func.func @transform_1(%arg0: i32, %arg1: i32) -> (i32, i32, i32) {
    %c0_i32 = arith.constant 0 : i32
    %c0_i32_0 = arith.constant 0 : i32
    %c0_i32_1 = arith.constant 0 : i32
    return %arg0, %c0_i32, %c0_i32_0 : i32, i32, i32
  }
  func.func @transform_2(%arg0: i32, %arg1: i32) -> (i32, i32, i32) {
    %c0_i32 = arith.constant 0 : i32
    %c0_i32_0 = arith.constant 0 : i32
    return %arg0, %c0_i32, %arg1 : i32, i32, i32
  }
  func.func @transform_3(%arg0: i32, %arg1: i32) -> (i32, i32, i32) {
    %c0_i32 = arith.constant 0 : i32
    %c0_i32_0 = arith.constant 0 : i32
    return %arg0, %c0_i32, %arg1 : i32, i32, i32
  }
  func.func @transform_4(%arg0: i32, %arg1: i32) -> (i32, i32, i32) {
    %c0_i32 = arith.constant 0 : i32
    %c0_i32_0 = arith.constant 0 : i32
    return %arg0, %c0_i32, %arg1 : i32, i32, i32
  }
}

</mosaic_0001>

<bundles_post_ra>
// kernel: tpu_custom_call.1
= control target key start
LH: loop header
LB: loop body
LE: loop exit
PB: predicated region body
PF: predicated region fallthrough
CT: control target
= control target key end

     0   :  { %10 = vsyncpa [#allocation3], 0  ;;  %s8714_s0 = inlined_call_operand.vmem [shape: f32[2,8], index: 0, kind: input, shape index: {}]   ;;  %s8715_s1 = inlined_call_operand.vmem [shape: f32[4,8,512], index: 1, kind: input, shape index: {}]   ;;  %s8716_s2 = inlined_call_operand.vmem [shape: bf16[4,512,16], index: 2, kind: input, shape index: {}]   ;;  %s8717_s3 = inlined_call_operand.hbm [shape: f32[4,2,16], index: 3, kind: output, shape index: {0}]   ;;  %s8718_s4 = inlined_call_operand.hbm [shape: f32[4,8,16], index: 4, kind: output, shape index: {1}]  }
   0x1   :  { %12 = vsyncpa [#allocation3 + $0x1], 0 }
   0x2   :  { %13 = vsyncpa [#allocation5], 0 }
   0x3   :  { %15 = vsyncpa [#allocation5 + $0x1], 0  ;;  %s6633_s15 = smov 0   ;;  %s6635_s16 = smov 0  }
   0x4   :  { %s6637_s17 = smov 0   ;;  %s6639_s18 = smov 0  }
   0x5   :  { %s6641_s19 = smov 0   ;;  %s6643_s20 = smov 0  }
   0x6 LB: > { %s4280_s21 = sadd.s32 4294967295, %s6598_s20   ;;  %s4281_s22 = sadd.s32 4294967294, %s6598_s20   ;;  %s6598_s20 = sphi %s6643_s20, %s21_s20   ;;  %s6594_s19 = sphi %s6641_s19, %s9164_s19   ;;  %s6590_s18 = sphi %s6639_s18, %s9163_s18   ;;  %s6586_s17 = sphi %s6637_s17, %s9162_s17   ;;  %s6582_s16 = sphi %s6635_s16, %s9161_s16   ;;  %s6578_s15 = sphi %s6633_s15, %s9160_s15  }
   0x7   : > { %s33_s23 = sadd.s32 1, %s6594_s19  ;;  %s117_s24 = sadd.s32 1, %s6586_s17 }
   0x8   : > { %p35_p0 = scmp.ge.s32.totalorder %s33_s23, 2  ;;  %p127_p1 = scmp.ne.s32.totalorder %s6586_s17, %s6582_s16 }
   0x9   : > { %p128_p2 = scmp.eq.s32.totalorder %s4280_s21, 1  ;;  %p133_p3 = scmp.ne.s32.totalorder %s6582_s16, %s6578_s15 }
   0xa   : > { %s9166_s23 = smov (%p35_p0, %s33_s23), 0  ;;  %p134_p5 = scmp.eq.s32.totalorder %s4281_s22, 1 }
   0xb   : > { %p6673_p4 = por %p128_p2, %p127_p1  ;;  %s112_s26 = ssub.s32 %s6594_s19, %s9166_s23 }
   0xc   : > { %p4284_p6 = scmp.ge.s32.totalorder %s6598_s20, 1  ;;  %p115_p7 = scmp.eq.s32.totalorder %s112_s26, 0 }
   0xd   : > { %p6680_p8 = por %p134_p5, %p133_p3  ;;  %p206_p9 = scmp.lt.s32.totalorder %s6598_s20, 3 }
   0xe   : > { %s6686_s28 = scalar_select %p115_p7, %s6586_s17, %s117_s24  }
   0xf   : > { %p207_p10 = pnand %p4284_p6, %p206_p9 }
  0x11   : > { %210 = sbr.rel (%p207_p10) target bundleno = 1192 (0x4a8), region = 32 }
  0x18   : > { %s4287_s29 = sshll.u32 %s6590_s18, 1  ;;  %vm6601_vm0 = vmmov 0   ;;  %vm1742_vm1 = vcmask 64512   ;;  %s8026_s14 = sand.u32 1, %s6582_s16   ;;  %vm1740_vm2 = vcmask 130048   ;;  %vm2192_vm3 = vcmask 123904  }
  0x19   : > { %p248_p11 = scmp.lt.s32.totalorder %s4287_s29, 3  ;;  %s4286_s21 = sshll.u32 %s8026_s14, 4 }
  0x1a   : > { %s8075_s22 = scalar_lea.vmem [#allocation4], %s4286_s21  ;;  %s4285_s24 = sshll.u32 %s8026_s14, 2 }
  0x1b   : > { %s9168_s29 = smov (!%p248_p11, %s4287_s29), 3  ;;  %s8596_s26 = scalar_lea.vmem [#allocation2], %s4285_s24 }
  0x1c   : > { %s4372_s30 = sshll.u32 %s9168_s29, 8  ;;  %s4371_s8 = sshll.u32 %s9168_s29, 5 }
  0x1d   : > { %s6695_s7 = scalar_lea.vmem %s8716_s2, %s4372_s30  ;;  %s6844_s11 = scalar_lea.vmem %s8715_s1, %s4371_s8 }
  0x1e   : > { %v6698_v0 = vld [vmem:[%s6695_s7 + $0x40] sm:$0xff]   ;;  %v6704_v2 = vld [vmem:[%s6695_s7 + $0x48] sm:$0xff]   ;;  %v6729_v16 = vld [vmem:[%s6695_s7 + $0x50] sm:$0xff]   ;;  %s4374_s29 = sshll.u32 %s6590_s18, 8  ;;  %s4156_s30 = sshll.u32 %s8075_s22, 4  ;;  %s8631_s30 = int_to_ptr.vmem [resolvable:$true] %s4156_s30 }
  0x1f   : > { %v6701_v1 = vld [vmem:[%s6695_s7] sm:$0xff]   ;;  %5619 = vmatprep.subr.bf16.mxu0 %v6698_v0  ;;  %v6708_v3 = vld [vmem:[%s6695_s7 + $0x8] sm:$0xff]   ;;  %v4409_v4 = vunpack.c.l.bf16 %v6698_v0  ;;  %v4410_v5 = vunpack.c.h.bf16 %v6698_v0  ;;  %v4413_v8 = vunpack.c.l.bf16 %v6704_v2  ;;  %v4414_v9 = vunpack.c.h.bf16 %v6704_v2  ;;  %v6750_v29 = vld [vmem:[%s6695_s7 + $0x10] sm:$0xff]   ;;  %s4125_s8 = scalar_lea.sflag [#allocation5], %s8026_s14  ;;  %s6488_s9 = scalar_lea.vmem %s8631_s30, 256 }
  0x20   : > { %v4377_v6 = vunpack.c.l.bf16 %v6701_v1  ;;  %v4378_v7 = vunpack.c.h.bf16 %v6701_v1  ;;  %5621 = vmatpush3.bf16.msra.mxu0 %v6701_v1  ;;  %v4381_v10 = vunpack.c.l.bf16 %v6708_v3  ;;  %v4382_v11 = vunpack.c.h.bf16 %v6708_v3  ;;  %v6765_v34 = vld [vmem:[%s6695_s7 + $0x58] sm:$0xff]   ;;  %v6787_v52 = vld [vmem:[%s6695_s7 + $0x60] sm:$0xff]   ;;  %p6489_p12 = scmp.ne.s32.totalorder %s8631_s30, %s6488_s9  ;;  %s6602_s10 = smov [#allocation4]  }
  0x21   : > { %5623 = vmatprep.subr.bf16.mxu0 %v6704_v2  ;;  %v6720_v12 = vsub.f32 %v4409_v4, %v4409_v4  ;;  %v6722_v13 = vsub.f32 %v4410_v5, %v4410_v5  ;;  %v6731_v17 = vsub.f32 %v4413_v8, %v4413_v8  ;;  %v6733_v18 = vsub.f32 %v4414_v9, %v4414_v9  ;;  %v6782_v48 = vld [vmem:[%s6695_s7 + $0x18] sm:$0xff]   ;;  %v6806_v5 = vld [vmem:[%s6695_s7 + $0x20] sm:$0xff]  }
  0x22   : > { %v6724_v14 = vsub.f32 %v4377_v6, %v4377_v6  ;;  %v6726_v15 = vsub.f32 %v4378_v7, %v4378_v7  ;;  %v6735_v19 = vsub.f32 %v4381_v10, %v4381_v10  ;;  %v6737_v20 = vsub.f32 %v4382_v11, %v4382_v11  ;;  %v6816_v10 = vld [vmem:[%s6695_s7 + $0x68] sm:$0xff]   ;;  %p6490_p13 = pnand %p6489_p12, %p6673_p4 }
  0x23   : > { %v8742_v21 = vand.u32 4294901760, %v6720_v12  ;;  %v8737_v22 = vand.u32 4294901760, %v6722_v13  ;;  %v8734_v25 = vand.u32 4294901760, %v6731_v17  ;;  %v8733_v26 = vand.u32 4294901760, %v6733_v18 }
  0x24   : > { %v8736_v23 = vand.u32 4294901760, %v6724_v14  ;;  %v8735_v24 = vand.u32 4294901760, %v6726_v15  ;;  %5625 = vmatpush3.bf16.msra.mxu0 %v6708_v3  ;;  %v8732_v27 = vand.u32 4294901760, %v6735_v19  ;;  %v8730_v28 = vand.u32 4294901760, %v6737_v20  ;;  %p6491_p0 = pneg %p6490_p13 }
  0x25   : > { %5627 = vmatprep.subr.bf16.mxu0 %v6729_v16  ;;  %v578_v30 = vsub.f32 %v6720_v12, %v8742_v21  ;;  %v584_v31 = vsub.f32 %v6722_v13, %v8737_v22  ;;  %v590_v35 = vsub.f32 %v6731_v17, %v8734_v25  ;;  %v596_v36 = vsub.f32 %v6733_v18, %v8733_v26 }
  0x26   : > { %v482_v32 = vsub.f32 %v6724_v14, %v8736_v23  ;;  %v488_v33 = vsub.f32 %v6726_v15, %v8735_v24  ;;  %v494_v37 = vsub.f32 %v6735_v19, %v8732_v27  ;;  %v500_v38 = vsub.f32 %v6737_v20, %v8730_v28 }
  0x27   : > { %v579_v39 = vand.u32 4294901760, %v578_v30  ;;  %v585_v40 = vand.u32 4294901760, %v584_v31  ;;  %v591_v43 = vand.u32 4294901760, %v590_v35  ;;  %v597_v44 = vand.u32 4294901760, %v596_v36 }
  0x28   : > { %v483_v41 = vand.u32 4294901760, %v482_v32  ;;  %v489_v42 = vand.u32 4294901760, %v488_v33  ;;  %5629 = vmatpush3.bf16.msra.mxu0 %v6750_v29  ;;  %v495_v45 = vand.u32 4294901760, %v494_v37  ;;  %v501_v46 = vand.u32 4294901760, %v500_v38 }
  0x29   : > { %5631 = vmatprep.subr.bf16.mxu0 %v6765_v34  ;;  %v5650_v47 = vpack.c.bf16 %v585_v40, %v579_v39  ;;  %v4417_v50 = vunpack.c.l.bf16 %v6729_v16  ;;  %v4418_v51 = vunpack.c.h.bf16 %v6729_v16  ;;  %v5654_v53 = vpack.c.bf16 %v597_v44, %v591_v43  ;;  %v6848_v44 = vld [vmem:[%s6695_s7 + $0x28] sm:$0xff]  }
  0x2a   : > { %v5652_v49 = vpack.c.bf16 %v489_v42, %v483_v41  ;;  %v5656_v54 = vpack.c.bf16 %v501_v46, %v495_v45  ;;  %v4385_v55 = vunpack.c.l.bf16 %v6750_v29  ;;  %v4386_v56 = vunpack.c.h.bf16 %v6750_v29  ;;  %8907 = vst [vmem:[#allocation8_spill] sm:$0xff] %v6848_v44 }
  0x2b   : > { %5651 = vmatprep.subr.bf16.mxu1 %v5650_v47  ;;  %v6791_v57 = vsub.f32 %v4417_v50, %v4417_v50  ;;  %v6793_v58 = vsub.f32 %v4418_v51, %v4418_v51  ;;  %v4421_v59 = vunpack.c.l.bf16 %v6765_v34  ;;  %v4422_v60 = vunpack.c.h.bf16 %v6765_v34  ;;  %v6857_v50 = vld [vmem:[%s6695_s7 + $0x70] sm:$0xff]  }
  0x2c   : > { %5633 = vmatpush3.bf16.msra.mxu0 %v6782_v48  ;;  %5653 = vmatpush3.bf16.msra.mxu1 %v5652_v49  ;;  %v6798_v61 = vsub.f32 %v4385_v55, %v4385_v55  ;;  %v6800_v62 = vsub.f32 %v4386_v56, %v4386_v56  ;;  %v4389_v63 = vunpack.c.l.bf16 %v6782_v48  ;;  %v4390_v4 = vunpack.c.h.bf16 %v6782_v48  ;;  %8908 = vst [vmem:[#allocation9_spill] sm:$0xff] %v6857_v50 }
  0x2d   : > { %5635 = vmatprep.subr.bf16.mxu0 %v6787_v52  ;;  %5655 = vmatprep.subr.bf16.mxu1 %v5654_v53  ;;  %v8728_v6 = vand.u32 4294901760, %v6791_v57  ;;  %v8726_v7 = vand.u32 4294901760, %v6793_v58  ;;  %v6810_v8 = vsub.f32 %v4421_v59, %v4421_v59  ;;  %v6812_v9 = vsub.f32 %v4422_v60, %v4422_v60  ;;  %v396_v60 = vld [vmem:[%s6844_s11 + $0x8] sm:$0xff] }
  0x2e   : > { %v8725_v11 = vand.u32 4294901760, %v6798_v61  ;;  %v8723_v30 = vand.u32 4294901760, %v6800_v62  ;;  %v6820_v31 = vsub.f32 %v4389_v63, %v4389_v63  ;;  %v6822_v32 = vsub.f32 %v4390_v4, %v4390_v4 }
  0x2f   : > { %v602_v33 = vsub.f32 %v6791_v57, %v8728_v6  ;;  %v608_v35 = vsub.f32 %v6793_v58, %v8726_v7  ;;  %v8722_v36 = vand.u32 4294901760, %v6810_v8  ;;  %v8721_v37 = vand.u32 4294901760, %v6812_v9 }
  0x30   : > { %5637 = vmatpush3.bf16.msra.mxu0 %v6806_v5  ;;  %5657 = vmatpush3.bf16.msra.mxu1 %v5656_v54  ;;  %v506_v38 = vsub.f32 %v6798_v61, %v8725_v11  ;;  %v512_v39 = vsub.f32 %v6800_v62, %v8723_v30  ;;  %v8720_v40 = vand.u32 4294901760, %v6820_v31  ;;  %v8719_v41 = vand.u32 4294901760, %v6822_v32 }
  0x31   : > { %5639 = vmatprep.subr.bf16.mxu0 %v6816_v10  ;;  %v603_v42 = vand.u32 4294901760, %v602_v33  ;;  %v609_v43 = vand.u32 4294901760, %v608_v35  ;;  %v614_v45 = vsub.f32 %v6810_v8, %v8722_v36  ;;  %v620_v46 = vsub.f32 %v6812_v9, %v8721_v37 }
  0x32   : > { %v507_v47 = vand.u32 4294901760, %v506_v38  ;;  %v513_v49 = vand.u32 4294901760, %v512_v39  ;;  %v518_v51 = vsub.f32 %v6820_v31, %v8720_v40  ;;  %v524_v53 = vsub.f32 %v6822_v32, %v8719_v41  ;;  %v6871_v39 = vld [vmem:[%s6695_s7 + $0x30] sm:$0xff]  }
  0x33   : > { %v5658_v54 = vpack.c.bf16 %v609_v43, %v603_v42  ;;  %v615_v55 = vand.u32 4294901760, %v614_v45  ;;  %v621_v56 = vand.u32 4294901760, %v620_v46  ;;  %v4425_v59 = vunpack.c.l.bf16 %v6787_v52  ;;  %8909 = vst [vmem:[#allocation10_spill] sm:$0xff] %v6871_v39 }
  0x34   : > { %5641 = vmatpush3.bf16.msra.mxu0 %v6848_v44  ;;  %v5660_v63 = vpack.c.bf16 %v513_v49, %v507_v47  ;;  %v519_v4 = vand.u32 4294901760, %v518_v51  ;;  %v525_v33 = vand.u32 4294901760, %v524_v53  ;;  %v4426_v35 = vunpack.c.h.bf16 %v6787_v52  ;;  %v6878_v47 = vld [vmem:[%s6695_s7 + $0x78] sm:$0xff]  }
  0x35   : > { %5659 = vmatprep.subr.bf16.mxu1 %v5658_v54  ;;  %5643 = vmatprep.subr.bf16.mxu0 %v6857_v50  ;;  %v5662_v38 = vpack.c.bf16 %v621_v56, %v615_v55  ;;  %v6873_v42 = vsub.f32 %v4425_v59, %v4425_v59  ;;  %v4393_v43 = vunpack.c.l.bf16 %v6806_v5  ;;  %v4394_v45 = vunpack.c.h.bf16 %v6806_v5  ;;  %8910 = vst [vmem:[#allocation11_spill] sm:$0xff] %v6878_v47 }
  0x36   : > { %5661 = vmatpush3.bf16.msra.mxu1 %v5660_v63  ;;  %v5664_v46 = vpack.c.bf16 %v525_v33, %v519_v4  ;;  %v6880_v49 = vsub.f32 %v4426_v35, %v4426_v35  ;;  %v6882_v51 = vand.u32 4294901760, %v396_v60  ;;  %v4429_v53 = vunpack.c.l.bf16 %v6816_v10  ;;  %v395_v63 = vld [vmem:[%s6844_s11] sm:$0xff] }
  0x37   : > { %5663 = vmatprep.subr.bf16.mxu1 %v5662_v38  ;;  %v8724_v54 = vand.u32 4294901760, %v6873_v42  ;;  %v6886_v55 = vsub.f32 %v4393_v43, %v4393_v43  ;;  %v6888_v56 = vsub.f32 %v4394_v45, %v4394_v45  ;;  %v4430_v59 = vunpack.c.h.bf16 %v6816_v10  ;;  %v6907_v45 = vld [vmem:[%s6695_s7 + $0x38] sm:$0xff]  }
  0x38   : > { %5645 = vmatpush3.bf16.msra.mxu0 %v6871_v39  ;;  %v8727_v4 = vand.u32 4294901760, %v6880_v49  ;;  %v6895_v33 = vsub.f32 %v396_v60, %v6882_v51  ;;  %v6897_v35 = vsub.f32 %v4429_v53, %v4429_v53  ;;  %v5682_v38 = vpack.c.bf16 %v6722_v13, %v6720_v12  ;;  %672 = vmatprep.mubr.f32.mxu1 %v6882_v51 }
  0x39   : > { %5647 = vmatprep.subr.bf16.mxu0 %v6878_v47  ;;  %v626_v43 = vsub.f32 %v6873_v42, %v8724_v54  ;;  %v8729_v41 = vand.u32 4294901760, %v6886_v55  ;;  %v8731_v60 = vand.u32 4294901760, %v6888_v56  ;;  %v6911_v40 = vsub.f32 %v4430_v59, %v4430_v59 }
  0x3a   : > { %5665 = vmatpush3.bf16.msra.mxu1 %v5664_v46  ;;  %v632_v53 = vsub.f32 %v6880_v49, %v8727_v4  ;;  %v8744_v37 = vand.u32 4294901760, %v6895_v33  ;;  %v8738_v36 = vand.u32 4294901760, %v6897_v35  ;;  %v6918_v30 = vand.u32 4294901760, %v395_v63 }
  0x3b   : > { %v627_v54 = vand.u32 4294901760, %v626_v43  ;;  %v530_v11 = vsub.f32 %v6886_v55, %v8729_v41  ;;  %v536_v59 = vsub.f32 %v6888_v56, %v8731_v60  ;;  %v8741_v46 = vand.u32 4294901760, %v6911_v40 }
  0x3c   : > { %v633_v7 = vand.u32 4294901760, %v632_v53  ;;  %5649 = vmatpush3.bf16.msra.mxu0 %v6907_v45  ;;  %v466_v4 = vsub.f32 %v6895_v33, %v8744_v37  ;;  %v638_v43 = vsub.f32 %v6897_v35, %v8738_v36  ;;  %v6935_v6 = vsub.f32 %v395_v63, %v6918_v30 }
  0x3d   : > { %v531_v41 = vand.u32 4294901760, %v530_v11  ;;  %v537_v28 = vand.u32 4294901760, %v536_v59  ;;  %v644_v60 = vsub.f32 %v6911_v40, %v8741_v46  ;;  %5683 = vmatprep.subr.bf16.mxu0 %v5682_v38  ;;  %v4397_v53 = vunpack.c.l.bf16 %v6848_v44 }
  0x3e   : > { %v5666_v27 = vpack.c.bf16 %v633_v7, %v627_v54  ;;  %v467_v26 = vand.u32 4294901760, %v466_v4  ;;  %v639_v25 = vand.u32 4294901760, %v638_v43  ;;  %v8739_v24 = vand.u32 4294901760, %v6935_v6 }
  0x3f   : > { %v5668_v23 = vpack.c.bf16 %v537_v28, %v531_v41  ;;  %v645_v22 = vand.u32 4294901760, %v644_v60  ;;  %v4398_v36 = vunpack.c.h.bf16 %v6848_v44  ;;  %v6943_v63 = vsub.f32 %v4397_v53, %v4397_v53 }
  0x40   : > { %5667 = vmatprep.subr.bf16.mxu1 %v5666_v27  ;;  %468 = vmatprep.mubr.f32.mxu0 %v467_v26  ;;  %v472_v11 = vsub.f32 %v6935_v6, %v8739_v24  ;;  %v5684_v38 = vpack.c.bf16 %v6726_v15, %v6724_v14  ;;  %v4433_v7 = vunpack.c.l.bf16 %v6857_v50  ;;  %v4434_v54 = vunpack.c.h.bf16 %v6857_v50 }
  0x41   : > { %5669 = vmatpush3.bf16.msra.mxu1 %v5668_v23  ;;  %v5670_v28 = vpack.c.bf16 %v645_v22, %v639_v25  ;;  %v8740_v41 = vand.u32 4294901760, %v6943_v63  ;;  %v6953_v4 = vsub.f32 %v4398_v36, %v4398_v36  ;;  %v5686_v26 = vpack.c.bf16 %v6733_v18, %v6731_v17 }
  0x42   : > { %v473_v27 = vand.u32 4294901760, %v472_v11  ;;  %v6957_v60 = vsub.f32 %v4433_v7, %v4433_v7  ;;  %v6959_v59 = vsub.f32 %v4434_v54, %v4434_v54  ;;  %v4401_v43 = vunpack.c.l.bf16 %v6871_v39 }
  0x43   : > { %5671 = vmatprep.subr.bf16.mxu1 %v5670_v28  ;;  %v542_v23 = vsub.f32 %v6943_v63, %v8740_v41  ;;  %v8743_v22 = vand.u32 4294901760, %v6953_v4  ;;  %v4402_v25 = vunpack.c.h.bf16 %v6871_v39  ;;  %v5688_v36 = vpack.c.bf16 %v6737_v20, %v6735_v19 }
  0x44   : > { %474 = vmatmul.mubr.f32.vlgmr.msra.gmra.mrb[0].mxu0 %v473_v27  ;;  %v8749_v53 = vand.u32 4294901760, %v6957_v60  ;;  %v8750_v11 = vand.u32 4294901760, %v6959_v59  ;;  %v6971_v7 = vsub.f32 %v4401_v43, %v4401_v43  ;;  %v4437_v54 = vunpack.c.l.bf16 %v6878_v47 }
  0x45   : > { %v543_v28 = vand.u32 4294901760, %v542_v23  ;;  %v548_v24 = vsub.f32 %v6953_v4, %v8743_v22  ;;  %5685 = vmatpush3.bf16.msra.mxu0 %v5684_v38  ;;  %v6977_v41 = vsub.f32 %v4402_v25, %v4402_v25  ;;  %v4438_v46 = vunpack.c.h.bf16 %v6878_v47  ;;  %777 = vmatprep.mubr.f32.mxu0 %v6895_v33 }
  0x46   : > { %v650_v27 = vsub.f32 %v6957_v60, %v8749_v53  ;;  %v656_v43 = vsub.f32 %v6959_v59, %v8750_v11  ;;  %5687 = vmatprep.subr.bf16.mxu0 %v5686_v26  ;;  %v553_v23 = vand.u32 4294901760, %v6971_v7  ;;  %v6988_v21 = vsub.f32 %v4437_v54, %v4437_v54 }
  0x47   : > { %v549_v38 = vand.u32 4294901760, %v548_v24  ;;  %v8755_v25 = vand.u32 4294901760, %v6977_v41  ;;  %v6991_v22 = vsub.f32 %v4438_v46, %v4438_v46  ;;  %v5690_v37 = vpack.c.bf16 %v6793_v58, %v6791_v57 }
  0x48   : > { %v651_v47 = vand.u32 4294901760, %v650_v27  ;;  %v657_v39 = vand.u32 4294901760, %v656_v43  ;;  %v554_v53 = vsub.f32 %v6971_v7, %v553_v23  ;;  %v8756_v26 = vand.u32 4294901760, %v6988_v21 }
  0x49   : > { %v5672_v11 = vpack.c.bf16 %v549_v38, %v543_v28  ;;  %v560_v24 = vsub.f32 %v6977_v41, %v8755_v25  ;;  %5689 = vmatpush3.bf16.msra.mxu0 %v5688_v36  ;;  %v667_v46 = vand.u32 4294901760, %v6991_v22  ;;  %v4405_v54 = vunpack.c.l.bf16 %v6907_v45 }
  0x4a   : > { %v5674_v50 = vpack.c.bf16 %v657_v39, %v651_v47  ;;  %v555_v44 = vand.u32 4294901760, %v554_v53  ;;  %v662_v27 = vsub.f32 %v6988_v21, %v8756_v26  ;;  %5691 = vmatprep.subr.bf16.mxu0 %v5690_v37  ;;  %v4406_v43 = vunpack.c.h.bf16 %v6907_v45 }
  0x4b   : > { %5673 = vmatpush3.bf16.msra.mxu1 %v5672_v11  ;;  %v561_v28 = vand.u32 4294901760, %v560_v24  ;;  %v668_v38 = vsub.f32 %v6991_v22, %v667_v46  ;;  %v7011_v36 = vsub.f32 %v4405_v54, %v4405_v54  ;;  %v5692_v25 = vpack.c.bf16 %v6800_v62, %v6798_v61 }
  0x4c   : > { %5675 = vmatprep.subr.bf16.mxu1 %v5674_v50  ;;  %v663_v39 = vand.u32 4294901760, %v662_v27  ;;  %v7015_v47 = vsub.f32 %v4406_v43, %v4406_v43  ;;  %v5694_v37 = vpack.c.bf16 %v6812_v9, %v6810_v8  ;;  %v5696_v24 = vpack.c.bf16 %v6822_v32, %v6820_v31 }
  0x4d   : > { %v5676_v53 = vpack.c.bf16 %v561_v28, %v555_v44  ;;  %v669_v26 = vand.u32 4294901760, %v668_v38  ;;  %v565_v11 = vand.u32 4294901760, %v7011_v36  ;;  %5693 = vmatpush3.bf16.msra.mxu0 %v5692_v25  ;;  %v5698_v50 = vpack.c.bf16 %v6880_v49, %v6873_v42 }
  0x4e   : > { %v571_v54 = vand.u32 4294901760, %v7015_v47  ;;  %5695 = vmatprep.subr.bf16.mxu0 %v5694_v37  ;;  %v5700_v28 = vpack.c.bf16 %v6888_v56, %v6886_v55  ;;  %v5702_v37 = vpack.c.bf16 %v6911_v40, %v6897_v35 }
  0x4f   : > { %5677 = vmatpush3.bf16.msra.mxu1 %v5676_v53  ;;  %v5678_v27 = vpack.c.bf16 %v669_v26, %v663_v39  ;;  %v566_v43 = vsub.f32 %v7011_v36, %v565_v11  ;;  %v5704_v39 = vpack.c.bf16 %v6953_v4, %v6943_v63  ;;  %v5706_v53 = vpack.c.bf16 %v6959_v59, %v6957_v60 }
  0x50   : > { %v572_v44 = vsub.f32 %v7015_v47, %v571_v54 }
  0x51   : > { %5679 = vmatprep.subr.bf16.mxu1 %v5678_v27  ;;  %v567_v25 = vand.u32 4294901760, %v566_v43  ;;  %5697 = vmatpush3.bf16.msra.mxu0 %v5696_v24  ;;  %v5708_v24 = vpack.c.bf16 %v6977_v41, %v6971_v7  ;;  %v8911_v27 = vand.u32 4294901760, %v6895_v33  ;;  %v5712_v43 = vpack.c.bf16 %v7015_v47, %v7011_v36 }
  0x52   : > { %v573_v38 = vand.u32 4294901760, %v572_v44  ;;  %5699 = vmatprep.subr.bf16.mxu0 %v5698_v50  ;;  %v5710_v50 = vpack.c.bf16 %v6991_v22, %v6988_v21  ;;  %v8912_v44 = vand.u32 4294901760, %v6720_v12  ;;  %v8915_v33 = vand.u32 4294901760, %v6726_v15  ;;  %v7169_v22 = vld [vmem:[%s6695_s7 + $0x90] sm:$0xff]  }
  0x53   : > { %v8918_v12 = vand.u32 4294901760, %v6735_v19  ;;  %v8920_v15 = vand.u32 4294901760, %v6791_v57  ;;  %v8923_v19 = vand.u32 4294901760, %v6800_v62  ;;  %v8926_v57 = vand.u32 4294901760, %v6820_v31 }
  0x54   : > { %v5680_v26 = vpack.c.bf16 %v573_v38, %v567_v25  ;;  %v8913_v25 = vand.u32 4294901760, %v6722_v13  ;;  %v8914_v38 = vand.u32 4294901760, %v6724_v14  ;;  %v8919_v13 = vand.u32 4294901760, %v6737_v20 }
  0x55   : > { %5701 = vmatpush3.bf16.msra.mxu0 %v5700_v28  ;;  %v8929_v62 = vand.u32 4294901760, %v6873_v42  ;;  %v8933_v31 = vand.u32 4294901760, %v6888_v56  ;;  %v8936_v42 = vand.u32 4294901760, %v6897_v35  ;;  %v8940_v56 = vand.u32 4294901760, %v6953_v4 }
  0x56   : > { %5681 = vmatpush3.bf16.msra.mxu1 %v5680_v26  ;;  %5703 = vmatprep.subr.bf16.mxu0 %v5702_v37  ;;  %v5746_v28 = vpack.c.bf16 %v8913_v25, %v8912_v44  ;;  %v5748_v37 = vpack.c.bf16 %v8915_v33, %v8914_v38  ;;  %v8916_v26 = vand.u32 4294901760, %v6731_v17  ;;  %v5752_v14 = vpack.c.bf16 %v8919_v13, %v8918_v12  ;;  %v8928_v44 = vld [vmem:[#allocation8_spill] sm:$0xff]  ;;  %v7120_v13 = vld [vmem:[%s6695_s7 + $0xc0] sm:$0xff]  }
  0x57   : > { %5715 = vmatprep.subr.bf16.mxu1 %v6698_v0  ;;  %v8921_v17 = vand.u32 4294901760, %v6793_v58  ;;  %v8927_v58 = vand.u32 4294901760, %v6822_v32  ;;  %v8932_v38 = vand.u32 4294901760, %v6886_v55  ;;  %v8939_v55 = vand.u32 4294901760, %v6943_v63 }
  0x58   : > { %v8942_v35 = vand.u32 4294901760, %v6959_v59 }
  0x59   : > { %674 = vmatmul.mubr.f32.vlgmr.msra.gmra.mrb[0].mxu1 %v6918_v30  ;;  %5705 = vmatpush3.bf16.msra.mxu0 %v5704_v39  ;;  %v8917_v39 = vand.u32 4294901760, %v6733_v18  ;;  %v5754_v18 = vpack.c.bf16 %v8921_v17, %v8920_v15  ;;  %v5764_v32 = vpack.c.bf16 %v8933_v31, %v8932_v38  ;;  %v5768_v12 = vpack.c.bf16 %v8940_v56, %v8939_v55  ;;  %v7131_v17 = vld [vmem:[%s6695_s7 + $0xc8] sm:$0xff]  }
  0x5a   : > { %5717 = vmatpush3.bf16.msra.mxu1 %v6701_v1  ;;  %5707 = vmatprep.subr.bf16.mxu0 %v5706_v53 }
  0x5b   : > { %5719 = vmatprep.subr.bf16.mxu1 %v6704_v2  ;;  %852 = vmatprep.mubr.f32.mxu1 %v8911_v27  ;;  %v5750_v53 = vpack.c.bf16 %v8917_v39, %v8916_v26  ;;  %v8925_v27 = vand.u32 4294901760, %v6812_v9  ;;  %v398_v9 = vld [vmem:[%s6844_s11 + $0x18] sm:$0xff]  ;;  %v8938_v39 = vld [vmem:[#allocation11_spill] sm:$0xff] }
  0x5c   : > { %v7104_v33 = vand.u32 4294901760, %v398_v9 }
  0x5d   : > { %5709 = vmatpush3.bf16.msra.mxu0 %v5708_v24  ;;  %v8922_v24 = vand.u32 4294901760, %v6798_v61  ;;  %v5760_v61 = vpack.c.bf16 %v8927_v58, %v8926_v57 }
  0x5e   : > { %5721 = vmatpush3.bf16.msra.mxu1 %v6708_v3  ;;  %5711 = vmatprep.subr.bf16.mxu0 %v5710_v50  ;;  %v8924_v50 = vand.u32 4294901760, %v6810_v8  ;;  %v8930_v8 = vand.u32 4294901760, %v6880_v49  ;;  %8934 = vst [vmem:[#allocation8_spill] sm:$0xff] %v7104_v33  ;;  %v8937_v49 = vand.u32 4294901760, %v6911_v40  ;;  %v8941_v40 = vand.u32 4294901760, %v6957_v60 }
  0x5f   : > { %5723 = vmatprep.subr.bf16.mxu1 %v6729_v16  ;;  %v5756_v20 = vpack.c.bf16 %v8923_v19, %v8922_v24  ;;  %v4474_v24 = vunpack.c.h.bf16 %v7120_v13  ;;  %v8943_v19 = vand.u32 4294901760, %v6935_v6  ;;  %v8944_v60 = vand.u32 4294901760, %v6977_v41 }
  0x60   : > { %v5762_v25 = vpack.c.bf16 %v8930_v8, %v8929_v62  ;;  %v5766_v26 = vpack.c.bf16 %v8937_v49, %v8936_v42  ;;  %v5770_v15 = vpack.c.bf16 %v8942_v35, %v8941_v40  ;;  %v4450_v8 = vunpack.c.h.bf16 %v7169_v22  ;;  %v7224_v35 = vld [vmem:[%s6695_s7 + $0xd8] sm:$0xff]  }
  0x61   : > { %5713 = vmatpush3.bf16.msra.mxu0 %v5712_v43  ;;  %v5758_v43 = vpack.c.bf16 %v8925_v27, %v8924_v50  ;;  %v5772_v59 = vpack.c.bf16 %v8944_v60, %v553_v23  ;;  %8949 = vst [vmem:[#allocation12_spill] sm:$0xff] %v7224_v35 }
  0x62   : > { %5725 = vmatpush3.bf16.msra.mxu1 %v6750_v29  ;;  %5747 = vmatprep.subr.bf16.mxu0 %v5746_v28  ;;  %v8931_v28 = vld [vmem:[#allocation9_spill] sm:$0xff]  ;;  %v7221_v40 = vsub.f32 %v4450_v8, %v4450_v8 }
  0x63   : > { %5727 = vmatprep.subr.bf16.mxu1 %v6765_v34  ;;  %8946 = vst [vmem:[#allocation9_spill] sm:$0xff] %v7169_v22 }
  0x64   : > { %780 = vmatmul.mubr.f32.vlgmr.msra.gmra.mrb[2].mxu0 %v6935_v6  ;;  %v8945_v6 = vand.u32 4294901760, %v6988_v21  ;;  %v7166_v21 = vld [vmem:[%s6695_s7 + $0xd0] sm:$0xff]  }
  0x65   : > { %5749 = vmatpush3.bf16.msra.mxu0 %v5748_v37  ;;  %990 = vmatprep.mubr.f32.mxu0 %v6882_v51  ;;  %v8935_v37 = vld [vmem:[#allocation10_spill] sm:$0xff]  ;;  %v4481_v62 = vunpack.c.l.bf16 %v7166_v21 }
  0x66   : > { %5729 = vmatpush3.bf16.msra.mxu1 %v6782_v48  ;;  %5751 = vmatprep.subr.bf16.mxu0 %v5750_v53  ;;  %v7113_v53 = vld [vmem:[%s6695_s7 + $0x80] sm:$0xff]   ;;  %v5774_v27 = vpack.c.bf16 %v667_v46, %v8945_v6  ;;  %v7173_v46 = vsub.f32 %v4474_v24, %v4474_v24  ;;  %v7251_v6 = vld [vmem:[%s6695_s7 + $0xa8] sm:$0xff]  }
  0x67   : > { %5731 = vmatprep.subr.bf16.mxu1 %v6787_v52  ;;  %v4441_v63 = vunpack.c.l.bf16 %v7113_v53  ;;  %v4442_v4 = vunpack.c.h.bf16 %v7113_v53  ;;  %8950 = vst [vmem:[#allocation13_spill] sm:$0xff] %v7251_v6 }
  0x69   : > { %5753 = vmatpush3.bf16.msra.mxu0 %v5752_v14  ;;  %v7123_v14 = vsub.f32 %v398_v9, %v7104_v33  ;;  %v7156_v41 = vsub.f32 %v4441_v63, %v4441_v63  ;;  %v7158_v7 = vsub.f32 %v4442_v4, %v4442_v4  ;;  %v4482_v9 = vunpack.c.h.bf16 %v7166_v21 }
  0x6a   : > { %5733 = vmatpush3.bf16.msra.mxu1 %v6806_v5  ;;  %5755 = vmatprep.subr.bf16.mxu0 %v5754_v18  ;;  %v4473_v18 = vunpack.c.l.bf16 %v7120_v13 }
  0x6b   : > { %5735 = vmatprep.subr.bf16.mxu1 %v6816_v10  ;;  %v8769_v50 = vand.u32 4294901760, %v7123_v14  ;;  %v8766_v58 = vand.u32 4294901760, %v7156_v41  ;;  %v7232_v63 = vsub.f32 %v4482_v9, %v4482_v9 }
  0x6c   : > { %v7171_v23 = vsub.f32 %v4473_v18, %v4473_v18 }
  0x6d   : > { %5757 = vmatpush3.bf16.msra.mxu0 %v5756_v20  ;;  %v4478_v20 = vunpack.c.h.bf16 %v7131_v17  ;;  %v1136_v36 = vsub.f32 %v7123_v14, %v8769_v50  ;;  %v1152_v55 = vsub.f32 %v7156_v41, %v8766_v58 }
  0x6e   : > { %5737 = vmatpush3.bf16.msra.mxu1 %v8928_v44  ;;  %5759 = vmatprep.subr.bf16.mxu0 %v5758_v43  ;;  %v7153_v43 = vld [vmem:[%s6695_s7 + $0x88] sm:$0xff]  }
  0x6f   : > { %5739 = vmatprep.subr.bf16.mxu1 %v8931_v28  ;;  %v4446_v47 = vunpack.c.h.bf16 %v7153_v43 }
  0x71   : > { %5761 = vmatpush3.bf16.msra.mxu0 %v5760_v61  ;;  %v8764_v61 = vand.u32 4294901760, %v7158_v7  ;;  %v7203_v42 = vsub.f32 %v4446_v47, %v4446_v47 }
  0x72   : > { %5741 = vmatpush3.bf16.msra.mxu1 %v8935_v37  ;;  %5763 = vmatprep.subr.bf16.mxu0 %v5762_v25  ;;  %v8768_v25 = vand.u32 4294901760, %v7171_v23 }
  0x73   : > { %5743 = vmatprep.subr.bf16.mxu1 %v8938_v39  ;;  %v1158_v56 = vsub.f32 %v7158_v7, %v8764_v61 }
  0x75   : > { %5765 = vmatpush3.bf16.msra.mxu0 %v5764_v32  ;;  %v1137_v32 = vand.u32 4294901760, %v1136_v36 }
  0x76   : > { %5745 = vmatpush3.bf16.msra.mxu1 %v6907_v45  ;;  %5767 = vmatprep.subr.bf16.mxu0 %v5766_v26 }
  0x77   : > { %5779 = vmatprep.subr.bf16.mxu1 %v6698_v0  ;;  %v4477_v0 = vunpack.c.l.bf16 %v7131_v17 }
  0x79   : > { %856 = vmatmul.mubr.f32.vlgmr.msra.gmra.mrb[2].mxu1 %v8943_v19  ;;  %5769 = vmatpush3.bf16.msra.mxu0 %v5768_v12  ;;  %v7176_v57 = vsub.f32 %v4477_v0, %v4477_v0  ;;  %v7216_v12 = vld [vmem:[%s6695_s7 + $0xa0] sm:$0xff]  }
  0x7a   : > { %5781 = vmatpush3.bf16.msra.mxu1 %v6701_v1  ;;  %5771 = vmatprep.subr.bf16.mxu0 %v5770_v15  ;;  %v5776_v1 = vpack.c.bf16 %v571_v54, %v565_v11  ;;  %v4449_v11 = vunpack.c.l.bf16 %v7169_v22  ;;  %v7188_v54 = vld [vmem:[%s6695_s7 + $0x98] sm:$0xff]   ;;  %8948 = vst [vmem:[#allocation11_spill] sm:$0xff] %v7216_v12  ;;  %v4458_v0 = vunpack.c.h.bf16 %v7216_v12 }
  0x7b   : > { %5783 = vmatprep.subr.bf16.mxu1 %v6704_v2  ;;  %1062 = vmatprep.mubr.f32.mxu1 %v6882_v51  ;;  %v4445_v2 = vunpack.c.l.bf16 %v7153_v43  ;;  %v7178_v51 = vsub.f32 %v4478_v20, %v4478_v20  ;;  %8947 = vst [vmem:[#allocation10_spill] sm:$0xff] %v7188_v54  ;;  %v8761_v38 = vand.u32 4294901760, %v7176_v57  ;;  %v4453_v49 = vunpack.c.l.bf16 %v7188_v54 }
  0x7c   : > { %v7207_v26 = vsub.f32 %v4449_v11, %v4449_v11  ;;  %v4454_v4 = vunpack.c.h.bf16 %v7188_v54  ;;  %v8757_v20 = vand.u32 4294901760, %v7203_v42  ;;  %v8762_v11 = vand.u32 4294901760, %v7232_v63 }
  0x7d   : > { %5773 = vmatpush3.bf16.msra.mxu0 %v5772_v59  ;;  %v8759_v31 = vand.u32 4294901760, %v7178_v51  ;;  %v1260_v18 = vsub.f32 %v7176_v57, %v8761_v38  ;;  %v7245_v60 = vsub.f32 %v4453_v49, %v4453_v49  ;;  %v4457_v59 = vunpack.c.l.bf16 %v7216_v12 }
  0x7e   : > { %5785 = vmatpush3.bf16.msra.mxu1 %v6708_v3  ;;  %5775 = vmatprep.subr.bf16.mxu0 %v5774_v27  ;;  %v8767_v3 = vand.u32 4294901760, %v7173_v46  ;;  %v1153_v27 = vand.u32 4294901760, %v1152_v55  ;;  %v7265_v49 = vsub.f32 %v4454_v4, %v4454_v4  ;;  %v8765_v4 = vand.u32 4294901760, %v7221_v40 }
  0x7f   : > { %5787 = vmatprep.subr.bf16.mxu1 %v6729_v16  ;;  %v7197_v16 = vsub.f32 %v4445_v2, %v4445_v2  ;;  %v1266_v24 = vsub.f32 %v7178_v51, %v8759_v31  ;;  %v1261_v8 = vand.u32 4294901760, %v1260_v18  ;;  %v7267_v55 = vsub.f32 %v4457_v59, %v4457_v59 }
  0x80   : > { %v1254_v15 = vsub.f32 %v7173_v46, %v8767_v3  ;;  %v7277_v18 = vsub.f32 %v4458_v0, %v4458_v0  ;;  %v7293_v0 = vld [vmem:[%s6695_s7 + $0xb0] sm:$0xff]   ;;  %v4462_v38 = vunpack.c.h.bf16 %v7251_v6 }
  0x81   : > { %5777 = vmatpush3.bf16.msra.mxu0 %v5776_v1  ;;  %v8758_v19 = vand.u32 4294901760, %v7197_v16  ;;  %v1159_v1 = vand.u32 4294901760, %v1158_v56  ;;  %v1267_v9 = vand.u32 4294901760, %v1266_v24  ;;  %v1170_v56 = vsub.f32 %v7203_v42, %v8757_v20  ;;  %8952 = vst [vmem:[#allocation15_spill] sm:$0xff] %v7293_v0 }
  0x82   : > { %5789 = vmatpush3.bf16.msra.mxu1 %v6750_v29  ;;  %5811 = vmatprep.subr.bf16.mxu0 %v7120_v13  ;;  %v7218_v29 = vsub.f32 %v4481_v62, %v4481_v62  ;;  %v1255_v47 = vand.u32 4294901760, %v1254_v15  ;;  %v4486_v62 = vunpack.c.h.bf16 %v7224_v35  ;;  %v7275_v15 = vld [vmem:[%s6695_s7 + $0xe0] sm:$0xff]  }
  0x83   : > { %5791 = vmatprep.subr.bf16.mxu1 %v6765_v34  ;;  %v1248_v34 = vsub.f32 %v7171_v23, %v8768_v25  ;;  %8951 = vst [vmem:[#allocation14_spill] sm:$0xff] %v7275_v15  ;;  %v7285_v20 = vpack.c.bf16 %v1159_v1, %v1153_v27  ;;  %v7296_v31 = vpack.c.bf16 %v1267_v9, %v1261_v8  ;;  %v1171_v27 = vand.u32 4294901760, %v1170_v56  ;;  %v7305_v1 = vld [vmem:[%s6695_s7 + $0xe8] sm:$0xff]  }
  0x84   : > { %992 = vmatmul.mubr.f32.vlgmr.msra.gmra.mrb[4].mxu0 %v6918_v30  ;;  %v8760_v2 = vand.u32 4294901760, %v7218_v29  ;;  %8953 = vst [vmem:[#allocation16_spill] sm:$0xff] %v7305_v1  ;;  %v4490_v8 = vunpack.c.h.bf16 %v7275_v15  ;;  %v4494_v58 = vunpack.c.h.bf16 %v7305_v1 }
  0x85   : > { %5813 = vmatpush3.bf16.msra.mxu0 %v7113_v53  ;;  %1138 = vmatprep.mubr.f32.mxu0 %v1137_v32  ;;  %v1249_v36 = vand.u32 4294901760, %v1248_v34  ;;  %v4461_v32 = vunpack.c.l.bf16 %v7251_v6  ;;  %v8763_v34 = vand.u32 4294901760, %v7207_v26 }
  0x86   : > { %5793 = vmatpush3.bf16.msra.mxu1 %v6782_v48  ;;  %5815 = vmatprep.subr.bf16.mxu0 %v7131_v17  ;;  %v4485_v48 = vunpack.c.l.bf16 %v7224_v35  ;;  %v7333_v50 = vsub.f32 %v4490_v8, %v4490_v8  ;;  %v8957_v8 = vand.u32 4294901760, %v7245_v60 }
  0x87   : > { %5795 = vmatprep.subr.bf16.mxu1 %v6787_v52  ;;  %v1164_v52 = vsub.f32 %v7197_v16, %v8758_v19  ;;  %v5842_v59 = vpack.c.bf16 %v1255_v47, %v1249_v36  ;;  %v7290_v19 = vsub.f32 %v4486_v62, %v4486_v62  ;;  %v397_v36 = vld [vmem:[%s6844_s11 + $0x10] sm:$0xff]  ;;  %v1176_v47 = vsub.f32 %v7207_v26, %v8763_v34 }
  0x88   : > { %v7283_v24 = vsub.f32 %v4485_v48, %v4485_v48  ;;  %v7299_v48 = vsub.f32 %v4461_v32, %v4461_v32  ;;  %v4489_v62 = vunpack.c.l.bf16 %v7275_v15  ;;  %v4465_v32 = vunpack.c.l.bf16 %v7293_v0 }
  0x89   : > { %5817 = vmatpush3.bf16.msra.mxu0 %v7153_v43  ;;  %v7320_v61 = vand.u32 4294901760, %v397_v36  ;;  %v1177_v34 = vand.u32 4294901760, %v1176_v47  ;;  %v7353_v3 = vsub.f32 %v7245_v60, %v8957_v8  ;;  %v8784_v8 = vand.u32 4294901760, %v7267_v55 }
  0x8a   : > { %5797 = vmatpush3.bf16.msra.mxu1 %v6806_v5  ;;  %5819 = vmatprep.subr.bf16.mxu0 %v7166_v21  ;;  %v1272_v5 = vsub.f32 %v7218_v29, %v8760_v2  ;;  %v1165_v2 = vand.u32 4294901760, %v1164_v52  ;;  %v8774_v52 = vand.u32 4294901760, %v7283_v24  ;;  %v7331_v25 = vsub.f32 %v4489_v62, %v4489_v62 }
  0x8b   : > { %5799 = vmatprep.subr.bf16.mxu1 %v6816_v10  ;;  %v1278_v10 = vsub.f32 %v7232_v63, %v8762_v11 }
  0x8c   : > { %v1273_v9 = vand.u32 4294901760, %v1272_v5  ;;  %v4466_v5 = vunpack.c.h.bf16 %v7293_v0 }
  0x8d   : > { %5821 = vmatpush3.bf16.msra.mxu0 %v7169_v22  ;;  %v1279_v56 = vand.u32 4294901760, %v1278_v10  ;;  %v5848_v10 = vpack.c.bf16 %v1171_v27, %v1165_v2  ;;  %v7345_v2 = vld [vmem:[%s6695_s7 + $0xf0] sm:$0xff]   ;;  %v8956_v27 = vand.u32 4294901760, %v7290_v19 }
  0x8e   : > { %5801 = vmatpush3.bf16.msra.mxu1 %v8928_v44  ;;  %5823 = vmatprep.subr.bf16.mxu0 %v7224_v35  ;;  %v1182_v44 = vsub.f32 %v7221_v40, %v8765_v4  ;;  %v4493_v4 = vunpack.c.l.bf16 %v7305_v1  ;;  %8955 = vst [vmem:[#allocation18_spill] sm:$0xff] %v7345_v2  ;;  %v7359_v47 = vsub.f32 %v4466_v5, %v4466_v5  ;;  %v8781_v5 = vand.u32 4294901760, %v7333_v50  ;;  %v7380_v35 = vld [vmem:[%s6695_s7 + $0xf8] sm:$0xff]  }
  0x8f   : > { %5803 = vmatprep.subr.bf16.mxu1 %v8931_v28  ;;  %v7323_v28 = vsub.f32 %v4462_v38, %v4462_v38  ;;  %v7336_v38 = vld [vmem:[%s6695_s7 + $0xb8] sm:$0xff]   ;;  %v1290_v62 = vsub.f32 %v7290_v19, %v8956_v27 }
  0x90   : > { %8954 = vst [vmem:[#allocation17_spill] sm:$0xff] %v7336_v38  ;;  %v1183_v11 = vand.u32 4294901760, %v1182_v44  ;;  %v7362_v44 = vsub.f32 %v4493_v4, %v4493_v4  ;;  %v1302_v27 = vsub.f32 %v7333_v50, %v8781_v5 }
  0x91   : > { %5825 = vmatpush3.bf16.msra.mxu0 %v7188_v54  ;;  %v1284_v54 = vsub.f32 %v7283_v24, %v8774_v52 }
  0x92   : > { %5805 = vmatpush3.bf16.msra.mxu1 %v8935_v37  ;;  %5827 = vmatprep.subr.bf16.mxu0 %v7275_v15  ;;  %v7342_v37 = vsub.f32 %v4465_v32, %v4465_v32  ;;  %v5850_v15 = vpack.c.bf16 %v1279_v56, %v1273_v9  ;;  %v4469_v9 = vunpack.c.l.bf16 %v7336_v38  ;;  %v7364_v32 = vsub.f32 %v4494_v58, %v4494_v58 }
  0x93   : > { %5807 = vmatprep.subr.bf16.mxu1 %v8938_v39  ;;  %v7356_v39 = vsub.f32 %v397_v36, %v7320_v61  ;;  %v8959_v56 = vand.u32 4294901760, %v7265_v49  ;;  %v5852_v4 = vpack.c.bf16 %v1183_v11, %v1177_v34  ;;  %v1285_v52 = vand.u32 4294901760, %v1284_v54 }
  0x94   : > { %v4497_v58 = vunpack.c.l.bf16 %v7345_v2  ;;  %v4470_v11 = vunpack.c.h.bf16 %v7336_v38  ;;  %v7387_v54 = vsub.f32 %v4469_v9, %v4469_v9  ;;  %v1200_v9 = vsub.f32 %v7267_v55, %v8784_v8 }
  0x95   : > { %8958 = vst [vmem:[#allocation19_spill] sm:$0xff] %v7356_v39  ;;  %5829 = vmatpush3.bf16.msra.mxu0 %v7216_v12  ;;  %v7371_v36 = vsub.f32 %v7265_v49, %v8959_v56  ;;  %v1291_v12 = vand.u32 4294901760, %v1290_v62  ;;  %v8787_v56 = vand.u32 4294901760, %v7277_v18  ;;  %v8960_v62 = vand.u32 4294901760, %v7331_v25 }
  0x96   : > { %5809 = vmatpush3.bf16.msra.mxu1 %v6907_v45  ;;  %5831 = vmatprep.subr.bf16.mxu0 %v7305_v1  ;;  %v4498_v45 = vunpack.c.h.bf16 %v7345_v2  ;;  %v1189_v1 = vand.u32 4294901760, %v7353_v3  ;;  %v4502_v34 = vunpack.c.h.bf16 %v7380_v35 }
  0x97   : > { %5843 = vmatprep.subr.bf16.mxu1 %v5842_v59  ;;  %v1195_v3 = vand.u32 4294901760, %v7371_v36  ;;  %v7404_v59 = vsub.f32 %v4497_v58, %v4497_v58  ;;  %v4501_v36 = vunpack.c.l.bf16 %v7380_v35  ;;  %v1206_v5 = vsub.f32 %v7277_v18, %v8787_v56 }
  0x98   : > { %v7419_v58 = vsub.f32 %v4470_v11, %v4470_v11  ;;  %v5874_v11 = vpack.c.bf16 %v7173_v46, %v7171_v23  ;;  %v7435_v22 = vsub.f32 %v4502_v34, %v4502_v34 }
  0x99   : > { %1064 = vmatmul.mubr.f32.vlgmr.msra.gmra.mrb[4].mxu1 %v6918_v30  ;;  %5833 = vmatpush3.bf16.msra.mxu0 %v7251_v6  ;;  %v1296_v30 = vsub.f32 %v7331_v25, %v8960_v62  ;;  %v5854_v62 = vpack.c.bf16 %v1291_v12, %v1285_v52  ;;  %v8963_v12 = vand.u32 4294901760, %v7364_v32 }
  0x9a   : > { %5845 = vmatpush3.bf16.msra.mxu1 %v7285_v20  ;;  %5835 = vmatprep.subr.bf16.mxu0 %v7345_v2  ;;  %v7406_v20 = vsub.f32 %v4498_v45, %v4498_v45  ;;  %v8961_v2 = vand.u32 4294901760, %v7356_v39  ;;  %v8962_v45 = vand.u32 4294901760, %v7362_v44 }
  0x9b   : > { %5847 = vmatprep.subr.bf16.mxu1 %v7296_v31  ;;  %1342 = vmatprep.mubr.f32.mxu1 %v7104_v33  ;;  %v1314_v52 = vsub.f32 %v7364_v32, %v8963_v12  ;;  %v1303_v33 = vand.u32 4294901760, %v1302_v27  ;;  %v1201_v31 = vand.u32 4294901760, %v1200_v9  ;;  %v1207_v12 = vand.u32 4294901760, %v1206_v5 }
  0x9c   : > { %v1142_v8 = vsub.f32 %v7356_v39, %v8961_v2  ;;  %v1308_v6 = vsub.f32 %v7362_v44, %v8962_v45  ;;  %v1297_v2 = vand.u32 4294901760, %v1296_v30  ;;  %v7433_v39 = vsub.f32 %v4501_v36, %v4501_v36 }
  0x9d   : > { %5837 = vmatpush3.bf16.msra.mxu0 %v7293_v0  ;;  %v5876_v27 = vpack.c.bf16 %v7158_v7, %v7156_v41  ;;  %v1315_v9 = vand.u32 4294901760, %v1314_v52  ;;  %v8965_v0 = vand.u32 4294901760, %v7323_v28  ;;  %v5856_v5 = vpack.c.bf16 %v1195_v3, %v1189_v1 }
  0x9e   : > { %5849 = vmatpush3.bf16.msra.mxu1 %v5848_v10  ;;  %5839 = vmatprep.subr.bf16.mxu0 %v7380_v35  ;;  %v1143_v56 = vand.u32 4294901760, %v1142_v8  ;;  %v8964_v10 = vand.u32 4294901760, %v7299_v48  ;;  %v5858_v8 = vpack.c.bf16 %v1303_v33, %v1297_v2  ;;  %v1229_v45 = vand.u32 4294901760, %v7359_v47 }
  0x9f   : > { %5851 = vmatprep.subr.bf16.mxu1 %v5850_v15  ;;  %v1309_v15 = vand.u32 4294901760, %v1308_v6  ;;  %v1218_v36 = vsub.f32 %v7323_v28, %v8965_v0  ;;  %v8967_v52 = vand.u32 4294901760, %v7406_v20  ;;  %v1331_v34 = vand.u32 4294901760, %v7433_v39 }
  0xa0   : > { %v1212_v30 = vsub.f32 %v7299_v48, %v8964_v10  ;;  %v5878_v10 = vpack.c.bf16 %v7178_v51, %v7176_v57  ;;  %v1337_v1 = vand.u32 4294901760, %v7435_v22  ;;  %v5860_v33 = vpack.c.bf16 %v1207_v12, %v1201_v31 }
  0xa1   : > { %5841 = vmatpush3.bf16.msra.mxu0 %v7336_v38  ;;  %v8966_v38 = vand.u32 4294901760, %v7404_v59  ;;  %v1326_v0 = vsub.f32 %v7406_v20, %v8967_v52  ;;  %v5862_v3 = vpack.c.bf16 %v1315_v9, %v1309_v15  ;;  %v1219_v2 = vand.u32 4294901760, %v1218_v36 }
  0xa2   : > { %5853 = vmatpush3.bf16.msra.mxu1 %v5852_v4  ;;  %5875 = vmatprep.subr.bf16.mxu0 %v5874_v11  ;;  %v1213_v4 = vand.u32 4294901760, %v1212_v30  ;;  %v1230_v31 = vsub.f32 %v7359_v47, %v1229_v45  ;;  %v8798_v12 = vand.u32 4294901760, %v7387_v54  ;;  %v8799_v30 = vand.u32 4294901760, %v7419_v58 }
  0xa3   : > { %5855 = vmatprep.subr.bf16.mxu1 %v5854_v62  ;;  %v1320_v6 = vsub.f32 %v7404_v59, %v8966_v38  ;;  %v8968_v62 = vand.u32 4294901760, %v7342_v37  ;;  %v5880_v38 = vpack.c.bf16 %v7203_v42, %v7197_v16  ;;  %v1327_v15 = vand.u32 4294901760, %v1326_v0 }
  0xa4   : > { %1144 = vmatmul.mubr.f32.vlgmr.msra.gmra.mrb[6].mxu0 %v1143_v56  ;;  %v5882_v56 = vpack.c.bf16 %v7232_v63, %v7218_v29  ;;  %v1332_v9 = vsub.f32 %v7433_v39, %v1331_v34  ;;  %v1338_v36 = vsub.f32 %v7435_v22, %v1337_v1  ;;  %v5884_v52 = vpack.c.bf16 %v7221_v40, %v7207_v26 }
  0xa5   : > { %5877 = vmatpush3.bf16.msra.mxu0 %v5876_v27  ;;  %v1224_v11 = vsub.f32 %v7342_v37, %v8968_v62  ;;  %1447 = vmatprep.mubr.f32.mxu0 %v7123_v14  ;;  %v1321_v27 = vand.u32 4294901760, %v1320_v6  ;;  %v1231_v62 = vand.u32 4294901760, %v1230_v31  ;;  %v1242_v6 = vsub.f32 %v7419_v58, %v8799_v30 }
  0xa6   : > { %5857 = vmatpush3.bf16.msra.mxu1 %v5856_v5  ;;  %5879 = vmatprep.subr.bf16.mxu0 %v5878_v10  ;;  %v5864_v5 = vpack.c.bf16 %v1219_v2, %v1213_v4  ;;  %v5886_v0 = vpack.c.bf16 %v7290_v19, %v7283_v24  ;;  %v1333_v2 = vand.u32 4294901760, %v1332_v9  ;;  %v5896_v9 = vpack.c.bf16 %v7323_v28, %v7299_v48 }
  0xa7   : > { %5859 = vmatprep.subr.bf16.mxu1 %v5858_v8  ;;  %v1225_v10 = vand.u32 4294901760, %v1224_v11  ;;  %v1236_v8 = vsub.f32 %v7387_v54, %v8798_v12  ;;  %v5866_v4 = vpack.c.bf16 %v1327_v15, %v1321_v27  ;;  %v1339_v11 = vand.u32 4294901760, %v1338_v36 }
  0xa8   : > { %v5890_v12 = vpack.c.bf16 %v7333_v50, %v7331_v25  ;;  %v5894_v15 = vpack.c.bf16 %v7364_v32, %v7362_v44  ;;  %v5898_v36 = vpack.c.bf16 %v7406_v20, %v7404_v59 }
  0xa9   : > { %5881 = vmatpush3.bf16.msra.mxu0 %v5880_v38  ;;  %v5868_v38 = vpack.c.bf16 %v1231_v62, %v1225_v10  ;;  %v1237_v31 = vand.u32 4294901760, %v1236_v8  ;;  %v5870_v30 = vpack.c.bf16 %v1339_v11, %v1333_v2  ;;  %v5904_v10 = vpack.c.bf16 %v7419_v58, %v7387_v54 }
  0xaa   : > { %5861 = vmatpush3.bf16.msra.mxu1 %v5860_v33  ;;  %5883 = vmatprep.subr.bf16.mxu0 %v5882_v56  ;;  %v5888_v33 = vpack.c.bf16 %v7265_v49, %v7245_v60  ;;  %v1243_v56 = vand.u32 4294901760, %v1242_v6  ;;  %v8971_v62 = vand.u32 4294901760, %v7173_v46  ;;  %v8972_v6 = vand.u32 4294901760, %v7156_v41  ;;  %v8978_v46 = vld [vmem:[#allocation19_spill] sm:$0xff] }
  0xab   : > { %5863 = vmatprep.subr.bf16.mxu1 %v5862_v3  ;;  %v5892_v3 = vpack.c.bf16 %v7277_v18, %v7267_v55  ;;  %v8975_v2 = vand.u32 4294901760, %v7176_v57  ;;  %v8976_v11 = vand.u32 4294901760, %v7178_v51  ;;  %v8980_v41 = vand.u32 4294901760, %v7203_v42  ;;  %v8988_v42 = vld [vmem:[#allocation11_spill] sm:$0xff] }
  0xac   : > { %v5872_v27 = vpack.c.bf16 %v1243_v56, %v1237_v31  ;;  %v8982_v56 = vld [vmem:[#allocation10_spill] sm:$0xff]  ;;  %v8983_v57 = vand.u32 4294901760, %v7218_v29  ;;  %v8984_v51 = vand.u32 4294901760, %v7232_v63  ;;  %v8991_v29 = vld [vmem:[#allocation16_spill] sm:$0xff]  ;;  %v8992_v63 = vand.u32 4294901760, %v7245_v60  ;;  %v9000_v60 = vld [vmem:[#allocation15_spill] sm:$0xff] }
  0xad   : > { %5885 = vmatpush3.bf16.msra.mxu0 %v5884_v52  ;;  %v8970_v52 = vand.u32 4294901760, %v7171_v23  ;;  %v8977_v23 = vld [vmem:[#allocation12_spill] sm:$0xff] }
  0xae   : > { %5865 = vmatpush3.bf16.msra.mxu1 %v5864_v5  ;;  %5887 = vmatprep.subr.bf16.mxu0 %v5886_v0  ;;  %v8969_v5 = vand.u32 4294901760, %v7123_v14  ;;  %v8973_v14 = vand.u32 4294901760, %v7158_v7  ;;  %v8981_v7 = vld [vmem:[#allocation8_spill] sm:$0xff] }
  0xaf   : > { %5867 = vmatprep.subr.bf16.mxu1 %v5866_v4  ;;  %v5938_v8 = vpack.c.bf16 %v8971_v62, %v8970_v52  ;;  %v8974_v4 = vld [vmem:[#allocation9_spill] sm:$0xff]  ;;  %v8996_v52 = vand.u32 4294901760, %v7333_v50  ;;  %v9003_v50 = vand.u32 4294901760, %v7299_v48 }
  0xb0   : > { %v5940_v0 = vpack.c.bf16 %v8973_v14, %v8972_v6  ;;  %v9002_v14 = vand.u32 4294901760, %v7364_v32  ;;  %v9009_v32 = vand.u32 4294901760, %v7342_v37 }
  0xb1   : > { %5889 = vmatpush3.bf16.msra.mxu0 %v5888_v33  ;;  %v5942_v33 = vpack.c.bf16 %v8976_v11, %v8975_v2  ;;  %v9007_v11 = vand.u32 4294901760, %v7406_v20 }
  0xb2   : > { %5869 = vmatpush3.bf16.msra.mxu1 %v5868_v38  ;;  %5891 = vmatprep.subr.bf16.mxu0 %v5890_v12  ;;  %v5900_v12 = vpack.c.bf16 %v7359_v47, %v7342_v37  ;;  %v8979_v38 = vand.u32 4294901760, %v7197_v16  ;;  %v8987_v16 = vand.u32 4294901760, %v7221_v40  ;;  %v8995_v40 = vand.u32 4294901760, %v7331_v25 }
  0xb3   : > { %5871 = vmatprep.subr.bf16.mxu1 %v5870_v30  ;;  %v5902_v30 = vpack.c.bf16 %v7435_v22, %v7433_v39  ;;  %v9004_v25 = vand.u32 4294901760, %v7323_v28  ;;  %v5964_v48 = vpack.c.bf16 %v1229_v45, %v9009_v32  ;;  %v5966_v28 = vpack.c.bf16 %v1337_v1, %v1331_v34 }
  0xb4   : > { %v5944_v31 = vpack.c.bf16 %v8980_v41, %v8979_v38  ;;  %v5954_v62 = vpack.c.bf16 %v8996_v52, %v8995_v40  ;;  %v9011_v37 = vand.u32 4294901760, %v7419_v58  ;;  %v7636_v40 = vld [vmem:[%s6695_s7 + $0x168] sm:$0xff]  }
  0xb5   : > { %5893 = vmatpush3.bf16.msra.mxu0 %v5892_v3  ;;  %v5946_v3 = vpack.c.bf16 %v8984_v51, %v8983_v57  ;;  %v5960_v2 = vpack.c.bf16 %v9004_v25, %v9003_v50  ;;  %v4663_v57 = vld [vmem:[%s6695_s7 + $0x108] sm:$0xff]   ;;  %v7622_v51 = vld [vmem:[%s6695_s7 + $0x150] sm:$0xff]  }
  0xb6   : > { %5873 = vmatpush3.bf16.msra.mxu1 %v5872_v27  ;;  %5895 = vmatprep.subr.bf16.mxu0 %v5894_v15  ;;  %v8985_v27 = vld [vmem:[#allocation14_spill] sm:$0xff]  ;;  %v8986_v15 = vand.u32 4294901760, %v7207_v26  ;;  %v8994_v26 = vld [vmem:[#allocation13_spill] sm:$0xff] }
  0xb7   : > { %5907 = vmatprep.subr.bf16.mxu1 %v7120_v13 }
  0xb9   : > { %1344 = vmatmul.mubr.f32.vlgmr.msra.gmra.mrb[6].mxu1 %v7320_v61  ;;  %5897 = vmatpush3.bf16.msra.mxu0 %v5896_v9  ;;  %v5948_v9 = vpack.c.bf16 %v8987_v16, %v8986_v15  ;;  %v4665_v15 = vld [vmem:[%s6695_s7 + $0x118] sm:$0xff]  }
  0xba   : > { %5909 = vmatpush3.bf16.msra.mxu1 %v7113_v53  ;;  %5899 = vmatprep.subr.bf16.mxu0 %v5898_v36  ;;  %v8989_v36 = vand.u32 4294901760, %v7283_v24  ;;  %v8997_v24 = vld [vmem:[#allocation18_spill] sm:$0xff] }
  0xbb   : > { %5911 = vmatprep.subr.bf16.mxu1 %v7131_v17  ;;  %1522 = vmatprep.mubr.f32.mxu1 %v8969_v5  ;;  %v8993_v5 = vand.u32 4294901760, %v7265_v49  ;;  %v9001_v49 = vand.u32 4294901760, %v7362_v44  ;;  %v9008_v44 = vand.u32 4294901760, %v8978_v46 }
  0xbd   : > { %5901 = vmatpush3.bf16.msra.mxu0 %v5900_v12  ;;  %v8990_v12 = vand.u32 4294901760, %v7290_v19  ;;  %v8998_v19 = vand.u32 4294901760, %v7267_v55  ;;  %v9005_v55 = vld [vmem:[#allocation17_spill] sm:$0xff] }
  0xbe   : > { %5913 = vmatpush3.bf16.msra.mxu1 %v7153_v43  ;;  %5903 = vmatprep.subr.bf16.mxu0 %v5902_v30 }
  0xbf   : > { %5915 = vmatprep.subr.bf16.mxu1 %v7166_v21  ;;  %v5950_v30 = vpack.c.bf16 %v8990_v12, %v8989_v36 }
  0xc1   : > { %5905 = vmatpush3.bf16.msra.mxu0 %v5904_v10  ;;  %v5952_v10 = vpack.c.bf16 %v8993_v5, %v8992_v63  ;;  %v4510_v63 = vunpack.c.h.bf16 %v4663_v57 }
  0xc2   : > { %5917 = vmatpush3.bf16.msra.mxu1 %v8974_v4  ;;  %5939 = vmatprep.subr.bf16.mxu0 %v5938_v8  ;;  %v8999_v8 = vand.u32 4294901760, %v7277_v18  ;;  %v9006_v18 = vand.u32 4294901760, %v7404_v59 }
  0xc3   : > { %5919 = vmatprep.subr.bf16.mxu1 %v8977_v23 }
  0xc4   : > { %1450 = vmatmul.mubr.f32.vlgmr.msra.gmra.mrb[8].mxu0 %v8978_v46  ;;  %v5956_v6 = vpack.c.bf16 %v8999_v8, %v8998_v19  ;;  %v4518_v19 = vunpack.c.h.bf16 %v4665_v15 }
  0xc5   : > { %5941 = vmatpush3.bf16.msra.mxu0 %v5940_v0  ;;  %1660 = vmatprep.mubr.f32.mxu0 %v8981_v7  ;;  %v5958_v0 = vpack.c.bf16 %v9002_v14, %v9001_v49 }
  0xc6   : > { %5921 = vmatpush3.bf16.msra.mxu1 %v8982_v56  ;;  %5943 = vmatprep.subr.bf16.mxu0 %v5942_v33  ;;  %v5962_v33 = vpack.c.bf16 %v9007_v11, %v9006_v18 }
  0xc7   : > { %5923 = vmatprep.subr.bf16.mxu1 %v8985_v27 }
  0xc9   : > { %5945 = vmatpush3.bf16.msra.mxu0 %v5944_v31  ;;  %v4670_v31 = vld [vmem:[%s6695_s7 + $0x140] sm:$0xff]  }
  0xca   : > { %5925 = vmatpush3.bf16.msra.mxu1 %v8988_v42  ;;  %5947 = vmatprep.subr.bf16.mxu0 %v5946_v3  ;;  %v4664_v3 = vld [vmem:[%s6695_s7 + $0x110] sm:$0xff]   ;;  %v4538_v50 = vunpack.c.h.bf16 %v4670_v31 }
  0xcb   : > { %5927 = vmatprep.subr.bf16.mxu1 %v8991_v29  ;;  %v4513_v5 = vunpack.c.l.bf16 %v4664_v3  ;;  %v4514_v52 = vunpack.c.h.bf16 %v4664_v3 }
  0xcc   : > { %v7657_v32 = vsub.f32 %v4538_v50, %v4538_v50 }
  0xcd   : > { %5949 = vmatpush3.bf16.msra.mxu0 %v5948_v9  ;;  %v7649_v18 = vsub.f32 %v4513_v5, %v4513_v5  ;;  %v7651_v11 = vsub.f32 %v4514_v52, %v4514_v52 }
  0xce   : > { %5929 = vmatpush3.bf16.msra.mxu1 %v8994_v26  ;;  %5951 = vmatprep.subr.bf16.mxu0 %v5950_v30 }
  0xcf   : > { %5931 = vmatprep.subr.bf16.mxu1 %v8997_v24 }
  0xd1   : > { %5953 = vmatpush3.bf16.msra.mxu0 %v5952_v10  ;;  %v7632_v10 = vld [vmem:[%s6695_s7 + $0x160] sm:$0xff]  }
  0xd2   : > { %5933 = vmatpush3.bf16.msra.mxu1 %v9000_v60  ;;  %5955 = vmatprep.subr.bf16.mxu0 %v5954_v62  ;;  %v4517_v62 = vunpack.c.l.bf16 %v4665_v15 }
  0xd3   : > { %5935 = vmatprep.subr.bf16.mxu1 %v7380_v35 }
  0xd5   : > { %5957 = vmatpush3.bf16.msra.mxu0 %v5956_v6 }
  0xd6   : > { %5937 = vmatpush3.bf16.msra.mxu1 %v9005_v55  ;;  %5959 = vmatprep.subr.bf16.mxu0 %v5958_v0  ;;  %v4537_v0 = vunpack.c.l.bf16 %v4670_v31 }
  0xd7   : > { %5971 = vmatprep.subr.bf16.mxu1 %v7120_v13  ;;  %v9010_v13 = vand.u32 4294901760, %v7387_v54 }
  0xd9   : > { %1526 = vmatmul.mubr.f32.vlgmr.msra.gmra.mrb[8].mxu1 %v9008_v44  ;;  %5961 = vmatpush3.bf16.msra.mxu0 %v5960_v2  ;;  %v5968_v59 = vpack.c.bf16 %v9011_v37, %v9010_v13  ;;  %v7655_v44 = vsub.f32 %v4537_v0, %v4537_v0 }
  0xda   : > { %5973 = vmatpush3.bf16.msra.mxu1 %v7113_v53  ;;  %5963 = vmatprep.subr.bf16.mxu0 %v5962_v33  ;;  %v7653_v33 = vsub.f32 %v4517_v62, %v4517_v62 }
  0xdb   : > { %5975 = vmatprep.subr.bf16.mxu1 %v7131_v17  ;;  %1732 = vmatprep.mubr.f32.mxu1 %v8981_v7  ;;  %v4662_v7 = vld [vmem:[%s6695_s7 + $0x100] sm:$0xff]  }
  0xdc   : > { %v4505_v36 = vunpack.c.l.bf16 %v4662_v7  ;;  %v4506_v12 = vunpack.c.h.bf16 %v4662_v7 }
  0xdd   : > { %5965 = vmatpush3.bf16.msra.mxu0 %v5964_v48  ;;  %v7659_v48 = vsub.f32 %v4518_v19, %v4518_v19 }
  0xde   : > { %5977 = vmatpush3.bf16.msra.mxu1 %v7153_v43  ;;  %5967 = vmatprep.subr.bf16.mxu0 %v5966_v28  ;;  %v7640_v49 = vsub.f32 %v4505_v36, %v4505_v36  ;;  %v7643_v25 = vsub.f32 %v4506_v12, %v4506_v12 }
  0xdf   : > { %5979 = vmatprep.subr.bf16.mxu1 %v7166_v21 }
  0xe0   : > { %v6068_v0 = vpack.c.bf16 %v7643_v25, %v7640_v49 }
  0xe1   : > { %5969 = vmatpush3.bf16.msra.mxu0 %v5968_v59  ;;  %v4358_v59 = vld [vmem:[%s6844_s11 + $0x28] sm:$0xff] }
  0xe2   : > { %5981 = vmatpush3.bf16.msra.mxu1 %v8974_v4 }
  0xe3   : > { %5983 = vmatprep.subr.bf16.mxu1 %v8977_v23 }
  0xe4   : > { %1662 = vmatmul.mubr.f32.vlgmr.msra.gmra.mrb[10].mxu0 %v7320_v61 }
  0xe6   : > { %5985 = vmatpush3.bf16.msra.mxu1 %v8982_v56  ;;  %v7617_v56 = vld [vmem:[%s6695_s7 + $0x148] sm:$0xff]  }
  0xe7   : > { %5987 = vmatprep.subr.bf16.mxu1 %v8985_v27  ;;  %v7626_v27 = vld [vmem:[%s6695_s7 + $0x158] sm:$0xff]  }
  0xea   : > { %5989 = vmatpush3.bf16.msra.mxu1 %v8988_v42 }
  0xeb   : > { %5991 = vmatprep.subr.bf16.mxu1 %v8991_v29  ;;  %v4509_v29 = vunpack.c.l.bf16 %v4663_v57 }
  0xed   : > { %v7645_v2 = vsub.f32 %v4509_v29, %v4509_v29 }
  0xee   : > { %5993 = vmatpush3.bf16.msra.mxu1 %v8994_v26  ;;  %v4666_v26 = vld [vmem:[%s6695_s7 + $0x120] sm:$0xff]  }
  0xef   : > { %5995 = vmatprep.subr.bf16.mxu1 %v8997_v24  ;;  %v4667_v24 = vld [vmem:[%s6695_s7 + $0x128] sm:$0xff]   ;;  %v4521_v8 = vunpack.c.l.bf16 %v4666_v26  ;;  %v4522_v6 = vunpack.c.h.bf16 %v4666_v26 }
  0xf0   : > { %v4526_v14 = vunpack.c.h.bf16 %v4667_v24 }
  0xf1   : > { %v7661_v28 = vsub.f32 %v4521_v8, %v4521_v8  ;;  %v7663_v13 = vsub.f32 %v4522_v6, %v4522_v6 }
  0xf2   : > { %5997 = vmatpush3.bf16.msra.mxu1 %v9000_v60  ;;  %v4525_v60 = vunpack.c.l.bf16 %v4667_v24 }
  0xf3   : > { %5999 = vmatprep.subr.bf16.mxu1 %v7380_v35 }
  0xf4   : > { %v7665_v37 = vsub.f32 %v4525_v60, %v4525_v60  ;;  %v6066_v60 = vpack.c.bf16 %v7657_v32, %v7655_v44 }
  0xf6   : > { %6001 = vmatpush3.bf16.msra.mxu1 %v9005_v55  ;;  %v7647_v55 = vsub.f32 %v4510_v63, %v4510_v63 }
  0xf7   : > { %6003 = vmatprep.subr.bf16.mxu1 %v4670_v31 }
  0xf8   : > { %v8809_v19 = vand.u32 4294901760, %v7647_v55 }
  0xf9   : > { %1734 = vmatmul.mubr.f32.vlgmr.msra.gmra.mrb[10].mxu1 %v7320_v61  ;;  %v8802_v61 = vmov 0.0  }
  0xfa   : > { %5558 = vmatprep.subr.mxu0 %v8802_v61  ;;  %5560 = vmatprep.mubr.msk.f32.mxu0 %vm6601_vm0, %v8802_v61 }
  0xfb   : > { %6005 = vmatpush3.bf16.msra.mxu1 %v4662_v7 }
  0xfc   : > { %6007 = vmatprep.subr.bf16.mxu1 %v7617_v56 }
  0xff   : > { %6009 = vmatpush3.bf16.msra.mxu1 %v4663_v57  ;;  %v4357_v57 = vld [vmem:[%s6844_s11 + $0x20] sm:$0xff] }
 0x100   : > { %6011 = vmatprep.subr.bf16.mxu1 %v7622_v51  ;;  %v7714_v5 = vand.u32 4294901760, %v4357_v57 }
 0x102   : > { %9013 = vst [vmem:[#allocation12_spill] sm:$0xff] %v7714_v5 }
 0x103   : > { %6013 = vmatpush3.bf16.msra.mxu1 %v4664_v3 }
 0x104   : > { %6015 = vmatprep.subr.bf16.mxu1 %v7626_v27 }
 0x107   : > { %6017 = vmatpush3.bf16.msra.mxu1 %v4665_v15 }
 0x108   : > { %6019 = vmatprep.subr.bf16.mxu1 %v7632_v10 }
 0x10b   : > { %6021 = vmatpush3.bf16.msra.mxu1 %v4666_v26 }
 0x10c   : > { %6023 = vmatprep.subr.bf16.mxu1 %v7636_v40 }
 0x10f   : > { %6025 = vmatpush3.bf16.msra.mxu1 %v4667_v24  ;;  %v8811_v24 = vand.u32 4294901760, %v7645_v2 }
 0x117   : > { %v4726_v53 = vpop.f32.mrb[0].mxu0 }
 0x118   : > { %v4727_v17 = vpop.f32.mrb[1].mxu0 }
 0x119   : > { %v4728_v43 = vadd.f32 %v4727_v17, %v4726_v53  ;;  %v7668_v17 = vsub.f32 %v4526_v14, %v4526_v14  ;;  %v7728_v14 = vsub.f32 %v4357_v57, %v7714_v5 }
 0x11b   : > { %9014 = vst [vmem:[#allocation19_spill] sm:$0xff] %v7728_v14 }
 0x12c   : > { %v4761_v21 = vpop.f32.mrb[0].mxu1 }
 0x12d   : > { %v4762_v22 = vpop.f32.mrb[1].mxu1 }
 0x12e   : > { %v4763_v39 = vadd.f32 %v4762_v22, %v4761_v21  ;;  %v8824_v21 = vand.u32 4294901760, %v7657_v32  ;;  %v7672_v22 = vand.u32 4294901760, %v4358_v59 }
 0x130   : > { %v676_v47 = vadd.f32 %v4763_v39, %v4728_v43  ;;  %v8825_v43 = vand.u32 4294901760, %v7655_v44  ;;  %v2513_v7 = vsub.f32 %v7657_v32, %v8824_v21 }
 0x132   : > { %v2514_v12 = vand.u32 4294901760, %v2513_v7 }
 0x137   : > { %v4796_v54 = vpop.f32.mrb[2].mxu0 }
 0x138   : > { %v4797_v20 = vpop.f32.mrb[3].mxu0 }
 0x139   : > { %v4798_v58 = vadd.f32 %v4797_v20, %v4796_v54  ;;  %v4668_v54 = vld [vmem:[%s6695_s7 + $0x130] sm:$0xff]   ;;  %v7679_v20 = vld [vmem:[%s6695_s7 + $0x178] sm:$0xff]  }
 0x13b   : > { %v782_v45 = vadd.f32 %v4798_v58, %v676_v47  ;;  %v7675_v47 = vld [vmem:[%s6695_s7 + $0x170] sm:$0xff]   ;;  %v8822_v58 = vand.u32 4294901760, %v7640_v49 }
 0x13c   : > { %6027 = vmatprep.subr.bf16.mxu1 %v7675_v47 }
 0x13d   : > { %6029 = vmatpush3.bf16.msra.mxu1 %v4668_v54 }
 0x13e   : > { %6031 = vmatprep.subr.bf16.mxu1 %v7679_v20 }
 0x14c   : > { %v4831_v34 = vpop.f32.mrb[2].mxu1 }
 0x14d   : > { %v4832_v35 = vpop.f32.mrb[3].mxu1 }
 0x14e   : > { %v4833_v1 = vadd.f32 %v4832_v35, %v4831_v34  ;;  %v4541_v34 = vunpack.c.l.bf16 %v7617_v56  ;;  %v4542_v35 = vunpack.c.h.bf16 %v7617_v56  ;;  %v2411_v56 = vsub.f32 %v7640_v49, %v8822_v58 }
 0x150   : > { %v858_v4 = vadd.f32 %v4833_v1, %v782_v45  ;;  %v8816_v45 = vand.u32 4294901760, %v7643_v25  ;;  %v2412_v29 = vand.u32 4294901760, %v2411_v56  ;;  %v7716_v26 = vsub.f32 %v4541_v34, %v4541_v34 }
 0x151   : > { %v7720_v62 = vsub.f32 %v4542_v35, %v4542_v35  ;;  %v8800_v34 = vand.u32 4294901760, %v7728_v14  ;;  %v2429_v35 = vsub.f32 %v7647_v55, %v8809_v19 }
 0x152   : > { %v2417_v63 = vsub.f32 %v7643_v25, %v8816_v45  ;;  %v8814_v50 = vand.u32 4294901760, %v7716_v26 }
 0x153   : > { %v6070_v7 = vpack.c.bf16 %v7720_v62, %v7716_v26 }
 0x154   : > { %v2418_v8 = vand.u32 4294901760, %v2417_v63 }
 0x157   : > { %v4866_v23 = vpop.f32.mrb[4].mxu0 }
 0x158   : > { %v4867_v46 = vpop.f32.mrb[5].mxu0 }
 0x159   : > { %v4868_v38 = vadd.f32 %v4867_v46, %v4866_v23  ;;  %v4530_v23 = vunpack.c.h.bf16 %v4668_v54  ;;  %v4669_v46 = vld [vmem:[%s6695_s7 + $0x138] sm:$0xff]  }
 0x15a   : > { %v4534_v31 = vunpack.c.h.bf16 %v4669_v46  ;;  %6033 = vmatpush3.bf16.msra.mxu1 %v4669_v46 }
 0x15b   : > { %v994_v41 = vadd.f32 %v4868_v38, %v858_v4  ;;  %v4529_v4 = vunpack.c.l.bf16 %v4668_v54  ;;  %v2507_v38 = vsub.f32 %v7655_v44, %v8825_v43  ;;  %6067 = vmatprep.subr.bf16.mxu1 %v6066_v60  ;;  %v8805_v60 = vand.u32 4294901760, %v7649_v18 }
 0x15c   : > { %v7706_v36 = vsub.f32 %v4534_v31, %v4534_v31  ;;  %v2430_v31 = vand.u32 4294901760, %v2429_v35  ;;  %v8804_v35 = vand.u32 4294901760, %v7651_v11 }
 0x15d   : > { %v7699_v15 = vsub.f32 %v4529_v4, %v4529_v4 }
 0x15f   : > { %v8829_v43 = vand.u32 4294901760, %v7699_v15 }
 0x16c   : > { %v4901_v16 = vpop.f32.mrb[4].mxu1 }
 0x16d   : > { %v4902_v9 = vpop.f32.mrb[5].mxu1 }
 0x16e   : > { %v4903_v42 = vadd.f32 %v4902_v9, %v4901_v16  ;;  %v7701_v16 = vsub.f32 %v4530_v23, %v4530_v23  ;;  %v2508_v9 = vand.u32 4294901760, %v2507_v38 }
 0x170   : > { %v1066_v30 = vadd.f32 %v4903_v42, %v994_v41  ;;  %v4533_v41 = vunpack.c.l.bf16 %v4669_v46  ;;  %v7718_v52 = vpack.c.bf16 %v2514_v12, %v2508_v9  ;;  %v4545_v46 = vunpack.c.l.bf16 %v7622_v51 }
 0x171   : > { %v6072_v9 = vpack.c.bf16 %v7647_v55, %v7645_v2  ;;  %v4546_v12 = vunpack.c.h.bf16 %v7622_v51  ;;  %v2435_v51 = vsub.f32 %v7649_v18, %v8805_v60 }
 0x172   : > { %v7704_v42 = vsub.f32 %v4533_v41, %v4533_v41  ;;  %v2401_v41 = vsub.f32 %v7728_v14, %v8800_v34 }
 0x177   : > { %v4936_v53 = vpop.f32.mrb[6].mxu0 }
 0x178   : > { %v4937_v39 = vpop.f32.mrb[7].mxu0 }
 0x179   : > { %v4938_v1 = vadd.f32 %v4937_v39, %v4936_v53  ;;  %v2423_v53 = vsub.f32 %v7645_v2, %v8811_v24  ;;  %v7737_v39 = vpack.c.bf16 %v2418_v8, %v2412_v29  ;;  %v2402_v29 = vand.u32 4294901760, %v2401_v41 }
 0x17a   : > { %v7763_v8 = vsub.f32 %v4545_v46, %v4545_v46  ;;  %v8807_v46 = vand.u32 4294901760, %v7653_v33  ;;  %v2441_v41 = vsub.f32 %v7651_v11, %v8804_v35 }
 0x17b   : > { %v7697_v3 = vadd.f32 %v4938_v1, %v1066_v30  ;;  %v7712_v30 = vsub.f32 %v4358_v59, %v7672_v22  ;;  %v8812_v59 = vand.u32 4294901760, %v7720_v62  ;;  %v2519_v1 = vsub.f32 %v7716_v26, %v8814_v50 }
 0x17c   : > { %v2424_v23 = vand.u32 4294901760, %v2423_v53  ;;  %v2442_v34 = vand.u32 4294901760, %v2441_v41 }
 0x17d   : > { %9012 = vst [vmem:[#allocation9_spill] sm:$0xff] %v7712_v30  ;;  %v8801_v6 = vand.u32 4294901760, %v7712_v30  ;;  %v2525_v4 = vsub.f32 %v7720_v62, %v8812_v59  ;;  %v2520_v56 = vand.u32 4294901760, %v2519_v1  ;;  %v4549_v1 = vunpack.c.l.bf16 %v7626_v27 }
 0x17e   : > { %v7761_v63 = vpack.c.bf16 %v2430_v31, %v2424_v23  ;;  %v4550_v23 = vunpack.c.h.bf16 %v7626_v27 }
 0x17f   : > { %v2395_v54 = vsub.f32 %v7712_v30, %v8801_v6  ;;  %v2526_v57 = vand.u32 4294901760, %v2525_v4  ;;  %v8806_v4 = vand.u32 4294901760, %v7763_v8  ;;  %v2447_v6 = vsub.f32 %v7653_v33, %v8807_v46 }
 0x181   : > { %v2396_v38 = vand.u32 4294901760, %v2395_v54  ;;  %v7766_v53 = vpack.c.bf16 %v2526_v57, %v2520_v56  ;;  %v7768_v54 = vsub.f32 %v4546_v12, %v4546_v12  ;;  %v6076_v56 = vpack.c.bf16 %v7651_v11, %v7649_v18 }
 0x182   : > { %v2531_v27 = vsub.f32 %v7763_v8, %v8806_v4  ;;  %v7790_v57 = vsub.f32 %v4549_v1, %v4549_v1  ;;  %v7792_v12 = vsub.f32 %v4550_v23, %v4550_v23  ;;  %v2448_v41 = vand.u32 4294901760, %v2447_v6 }
 0x183   : > { %2397 = vmatprep.mubr.f32.mxu1 %v2396_v38  ;;  %v8808_v38 = vand.u32 4294901760, %v7768_v54  ;;  %v6074_v31 = vpack.c.bf16 %v7768_v54, %v7763_v8 }
 0x184   : > { %2403 = vmatmul.mubr.f32.vlgmr.msra.gmra.mrb[12].mxu1 %v2402_v29  ;;  %v2532_v61 = vand.u32 4294901760, %v2531_v27  ;;  %v8813_v35 = vand.u32 4294901760, %v7790_v57  ;;  %v6078_v1 = vpack.c.bf16 %v7792_v12, %v7790_v57 }
 0x185   : > { %6069 = vmatpush3.bf16.msra.mxu1 %v6068_v0  ;;  %2706 = vmatprep.mubr.f32.mxu1 %v7712_v30  ;;  %v2436_v0 = vand.u32 4294901760, %v2435_v51  ;;  %v2537_v29 = vsub.f32 %v7768_v54, %v8808_v38  ;;  %v8815_v51 = vand.u32 4294901760, %v7792_v12 }
 0x186   : > { %6071 = vmatprep.subr.bf16.mxu1 %v6070_v7  ;;  %v8810_v7 = vand.u32 4294901760, %v7659_v48  ;;  %v2543_v27 = vsub.f32 %v7790_v57, %v8813_v35  ;;  %v8818_v35 = vand.u32 4294901760, %v7661_v28 }
 0x187   : > { %v2538_v60 = vand.u32 4294901760, %v2537_v29  ;;  %v7805_v4 = vpack.c.bf16 %v2442_v34, %v2436_v0  ;;  %v2549_v19 = vsub.f32 %v7792_v12, %v8815_v51  ;;  %v4553_v34 = vunpack.c.l.bf16 %v7632_v10 }
 0x188   : > { %v2453_v46 = vsub.f32 %v7659_v48, %v8810_v7  ;;  %v4554_v7 = vunpack.c.h.bf16 %v7632_v10 }
 0x189   : > { %6073 = vmatpush3.bf16.msra.mxu1 %v6072_v9  ;;  %v6080_v9 = vpack.c.bf16 %v7659_v48, %v7653_v33  ;;  %v7819_v0 = vpack.c.bf16 %v2538_v60, %v2532_v61  ;;  %v2550_v24 = vand.u32 4294901760, %v2549_v19  ;;  %v7822_v59 = vsub.f32 %v4553_v34, %v4553_v34 }
 0x18a   : > { %6075 = vmatprep.subr.bf16.mxu1 %v6074_v31  ;;  %v2454_v29 = vand.u32 4294901760, %v2453_v46  ;;  %v2544_v31 = vand.u32 4294901760, %v2543_v27  ;;  %v7828_v45 = vsub.f32 %v4554_v7, %v4554_v7  ;;  %v2459_v19 = vsub.f32 %v7661_v28, %v8818_v35 }
 0x18b   : > { %v8821_v10 = vand.u32 4294901760, %v7822_v59  ;;  %v6084_v60 = vpack.c.bf16 %v7663_v13, %v7661_v28 }
 0x18c   : > { %v4971_v23 = vpop.f32.mrb[6].mxu1  ;;  %v7826_v51 = vpack.c.bf16 %v2454_v29, %v2448_v41  ;;  %v7831_v61 = vpack.c.bf16 %v2550_v24, %v2544_v31  ;;  %v6082_v24 = vpack.c.bf16 %v7828_v45, %v7822_v59  ;;  %v8820_v41 = vand.u32 4294901760, %v7665_v37 }
 0x18d   : > { %v4972_v38 = vpop.f32.mrb[7].mxu1  ;;  %6077 = vmatpush3.bf16.msra.mxu1 %v6076_v56  ;;  %v4557_v56 = vunpack.c.l.bf16 %v7636_v40  ;;  %v2555_v7 = vsub.f32 %v7822_v59, %v8821_v10  ;;  %v8823_v29 = vand.u32 4294901760, %v7668_v17 }
 0x18e   : > { %v4973_v6 = vadd.f32 %v4972_v38, %v4971_v23  ;;  %v8817_v38 = vand.u32 4294901760, %v7663_v13  ;;  %6079 = vmatprep.subr.bf16.mxu1 %v6078_v1  ;;  %v2460_v1 = vand.u32 4294901760, %v2459_v19  ;;  %v4558_v23 = vunpack.c.h.bf16 %v7636_v40 }
 0x18f   : > { %v2556_v31 = vand.u32 4294901760, %v2555_v7  ;;  %v2471_v40 = vsub.f32 %v7665_v37, %v8820_v41  ;;  %v4561_v41 = vunpack.c.l.bf16 %v7675_v47 }
 0x190   : > { %v1346_v50 = vadd.f32 %v4973_v6, %v7697_v3  ;;  %v8819_v3 = vand.u32 4294901760, %v7828_v45  ;;  %v2465_v46 = vsub.f32 %v7663_v13, %v8817_v38  ;;  %v7854_v6 = vsub.f32 %v4557_v56, %v4557_v56 }
 0x191   : > { %6081 = vmatpush3.bf16.msra.mxu1 %v6080_v9  ;;  %v7857_v38 = vsub.f32 %v4558_v23, %v4558_v23  ;;  %v6088_v9 = vpack.c.bf16 %v7668_v17, %v7665_v37  ;;  %v2477_v56 = vsub.f32 %v7668_v17, %v8823_v29  ;;  %v2472_v23 = vand.u32 4294901760, %v2471_v40 }
 0x192   : > { %v2561_v27 = vsub.f32 %v7828_v45, %v8819_v3  ;;  %v2466_v34 = vand.u32 4294901760, %v2465_v46  ;;  %6083 = vmatprep.subr.bf16.mxu1 %v6082_v24  ;;  %v8826_v46 = vand.u32 4294901760, %v7854_v6  ;;  %v7883_v21 = vsub.f32 %v4561_v41, %v4561_v41 }
 0x193   : > { %v8830_v24 = vand.u32 4294901760, %v7857_v38  ;;  %v6086_v3 = vpack.c.bf16 %v7857_v38, %v7854_v6 }
 0x194   : > { %v2562_v19 = vand.u32 4294901760, %v2561_v27  ;;  %v7864_v35 = vpack.c.bf16 %v2466_v34, %v2460_v1  ;;  %v2567_v1 = vsub.f32 %v7854_v6, %v8826_v46  ;;  %v2478_v27 = vand.u32 4294901760, %v2477_v56 }
 0x195   : > { %6085 = vmatpush3.bf16.msra.mxu1 %v6084_v60  ;;  %v4562_v34 = vunpack.c.h.bf16 %v7675_v47  ;;  %v2573_v40 = vsub.f32 %v7857_v38, %v8830_v24  ;;  %v8828_v46 = vand.u32 4294901760, %v7701_v16  ;;  %v8831_v47 = vand.u32 4294901760, %v7883_v21 }
 0x196   : > { %9015 = vst [vmem:[#allocation8_spill] sm:$0xff] %v7864_v35  ;;  %v7874_v58 = vpack.c.bf16 %v2562_v19, %v2556_v31  ;;  %6087 = vmatprep.subr.bf16.mxu1 %v6086_v3  ;;  %v2568_v31 = vand.u32 4294901760, %v2567_v1  ;;  %v7886_v19 = vpack.c.bf16 %v2478_v27, %v2472_v23 }
 0x197   : > { %v5006_v7 = vpop.f32.mrb[8].mxu0  ;;  %v7888_v60 = vsub.f32 %v4562_v34, %v4562_v34  ;;  %v2574_v30 = vand.u32 4294901760, %v2573_v40  ;;  %v2489_v41 = vsub.f32 %v7701_v16, %v8828_v46  ;;  %v2579_v23 = vsub.f32 %v7883_v21, %v8831_v47 }
 0x198   : > { %v5007_v10 = vpop.f32.mrb[9].mxu0  ;;  %9016 = vst [vmem:[#allocation10_spill] sm:$0xff] %v7874_v58  ;;  %9017 = vst [vmem:[#allocation14_spill] sm:$0xff] %v7886_v19  ;;  %v4566_v40 = vunpack.c.h.bf16 %v7679_v20  ;;  %v8833_v46 = vand.u32 4294901760, %v7704_v42 }
 0x199   : > { %v5008_v29 = vadd.f32 %v5007_v10, %v5006_v7  ;;  %v2483_v10 = vsub.f32 %v7699_v15, %v8829_v43  ;;  %6089 = vmatpush3.bf16.msra.mxu1 %v6088_v9  ;;  %v8832_v3 = vand.u32 4294901760, %v7888_v60  ;;  %v6090_v7 = vpack.c.bf16 %v7888_v60, %v7883_v21 }
 0x19a   : > { %v4565_v9 = vunpack.c.l.bf16 %v7679_v20  ;;  %v2490_v34 = vand.u32 4294901760, %v2489_v41  ;;  %v2580_v43 = vand.u32 4294901760, %v2579_v23  ;;  %v9020_v23 = vand.u32 4294901760, %v7655_v44 }
 0x19b   : > { %v1452_v56 = vadd.f32 %v5008_v29, %v1346_v50  ;;  %v6092_v50 = vpack.c.bf16 %v7701_v16, %v7699_v15  ;;  %v7903_v29 = vpack.c.bf16 %v2574_v30, %v2568_v31  ;;  %v2484_v1 = vand.u32 4294901760, %v2483_v10  ;;  %6091 = vmatprep.subr.bf16.mxu1 %v6090_v7 }
 0x19c   : > { %v2585_v27 = vsub.f32 %v7888_v60, %v8832_v3  ;;  %v7914_v30 = vsub.f32 %v4565_v9, %v4565_v9  ;;  %v8834_v31 = vand.u32 4294901760, %v7706_v36  ;;  %v2595_v10 = vsub.f32 %v4566_v40, %v4566_v40 }
 0x19d   : > { %9018 = vst [vmem:[#allocation11_spill] sm:$0xff] %v7903_v29  ;;  %v7917_v47 = vpack.c.bf16 %v2490_v34, %v2484_v1  ;;  %6093 = vmatpush3.bf16.msra.mxu1 %v6092_v50  ;;  %v2495_v3 = vsub.f32 %v7704_v42, %v8833_v46  ;;  %v6096_v7 = vpack.c.bf16 %v7706_v36, %v7704_v42  ;;  %v9021_v1 = vand.u32 4294901760, %v7657_v32 }
 0x19e   : > { %v2586_v24 = vand.u32 4294901760, %v2585_v27  ;;  %v2590_v41 = vand.u32 4294901760, %v7914_v30  ;;  %v2501_v20 = vsub.f32 %v7706_v36, %v8834_v31  ;;  %v2596_v27 = vand.u32 4294901760, %v2595_v10 }
 0x19f   : > { %9019 = vst [vmem:[#allocation16_spill] sm:$0xff] %v7917_v47  ;;  %v6130_v9 = vpack.c.bf16 %v9021_v1, %v9020_v23  ;;  %v2496_v34 = vand.u32 4294901760, %v2495_v3  ;;  %v6094_v40 = vpack.c.bf16 %v2595_v10, %v7914_v30  ;;  %v9024_v44 = vand.u32 4294901760, %v7640_v49 }
 0x1a0   : > { %v7932_v50 = vpack.c.bf16 %v2586_v24, %v2580_v43  ;;  %v2591_v46 = vsub.f32 %v7914_v30, %v2590_v41  ;;  %v2502_v47 = vand.u32 4294901760, %v2501_v20  ;;  %v2597_v19 = vsub.f32 %v2595_v10, %v2596_v27 }
 0x1a1   : > { %6095 = vmatprep.subr.bf16.mxu1 %v6094_v40  ;;  %v9025_v32 = vand.u32 4294901760, %v7643_v25  ;;  %v9026_v24 = vand.u32 4294901760, %v7716_v26  ;;  %v9027_v3 = vand.u32 4294901760, %v7720_v62  ;;  %v9031_v25 = vand.u32 4294901760, %v7763_v8 }
 0x1a2   : > { %9022 = vst [vmem:[#allocation13_spill] sm:$0xff] %v7932_v50  ;;  %v2592_v31 = vand.u32 4294901760, %v2591_v46  ;;  %v7936_v29 = vpack.c.bf16 %v2502_v47, %v2496_v34  ;;  %6097 = vmatpush3.bf16.msra.mxu1 %v6096_v7  ;;  %v2598_v43 = vand.u32 4294901760, %v2597_v19  ;;  %v9029_v46 = vand.u32 4294901760, %v7645_v2 }
 0x1a3   : > { %v6132_v23 = vpack.c.bf16 %v9025_v32, %v9024_v44  ;;  %6131 = vmatprep.subr.bf16.mxu1 %v6130_v9  ;;  %v6134_v1 = vpack.c.bf16 %v9027_v3, %v9026_v24  ;;  %v9030_v47 = vand.u32 4294901760, %v7647_v55  ;;  %v9032_v26 = vand.u32 4294901760, %v7768_v54 }
 0x1a4   : > { %9023 = vst [vmem:[#allocation18_spill] sm:$0xff] %v7936_v29  ;;  %v7946_v30 = vpack.c.bf16 %v2598_v43, %v2592_v31  ;;  %v9033_v31 = vand.u32 4294901760, %v7649_v18  ;;  %v9034_v20 = vand.u32 4294901760, %v7651_v11  ;;  %v9035_v55 = vand.u32 4294901760, %v7790_v57 }
 0x1a5   : > { %2709 = vmatmul.mubr.f32.vlgmr.msra.gmra.mrb[14].mxu1 %v7728_v14  ;;  %v6136_v49 = vpack.c.bf16 %v9030_v47, %v9029_v46  ;;  %v6138_v19 = vpack.c.bf16 %v9032_v26, %v9031_v25  ;;  %v9036_v9 = vand.u32 4294901760, %v7792_v12  ;;  %v9037_v8 = vand.u32 4294901760, %v7653_v33 }
 0x1a6   : > { %9028 = vst [vmem:[#allocation15_spill] sm:$0xff] %v7946_v30  ;;  %6133 = vmatpush3.bf16.msra.mxu1 %v6132_v23  ;;  %2919 = vmatprep.mubr.f32.mxu1 %v7672_v22  ;;  %v6140_v7 = vpack.c.bf16 %v9034_v20, %v9033_v31  ;;  %v9038_v54 = vand.u32 4294901760, %v7659_v48  ;;  %v9039_v18 = vand.u32 4294901760, %v7822_v59  ;;  %v9040_v11 = vand.u32 4294901760, %v7828_v45 }
 0x1a7   : > { %6135 = vmatprep.subr.bf16.mxu1 %v6134_v1  ;;  %v6142_v34 = vpack.c.bf16 %v9036_v9, %v9035_v55  ;;  %v9041_v23 = vand.u32 4294901760, %v7661_v28  ;;  %v9042_v57 = vand.u32 4294901760, %v7663_v13  ;;  %v9044_v33 = vand.u32 4294901760, %v7857_v38  ;;  %v266_v38 = vld [vmem:[%s8714_s0] sm:$0x3] }
 0x1a8   : > { %v6144_v44 = vpack.c.bf16 %v9038_v54, %v9037_v8  ;;  %v6146_v32 = vpack.c.bf16 %v9040_v11, %v9039_v18  ;;  %v9045_v59 = vand.u32 4294901760, %v7665_v37  ;;  %v9046_v45 = vand.u32 4294901760, %v7668_v17  ;;  %v8044_v8 = vld [vmem:[%s6695_s7 + $0x1d8] sm:$0xff]  }
 0x1a9   : > { %v6148_v12 = vpack.c.bf16 %v9042_v57, %v9041_v23  ;;  %v9047_v28 = vand.u32 4294901760, %v7883_v21  ;;  %v9048_v13 = vand.u32 4294901760, %v7888_v60  ;;  %v9049_v37 = vand.u32 4294901760, %v7699_v15  ;;  %9061 = vst [vmem:[#allocation27_spill] sm:$0xff] %v8044_v8  ;;  %v8047_v54 = vld [vmem:[%s6695_s7 + $0x198] sm:$0xff]  }
 0x1aa   : > { %6137 = vmatpush3.bf16.msra.mxu1 %v6136_v49  ;;  %v6152_v1 = vpack.c.bf16 %v9046_v45, %v9045_v59  ;;  %v9050_v17 = vand.u32 4294901760, %v7701_v16  ;;  %v1744_v49 = vsel %vm1742_vm1, %v266_v38, 0  ;;  %v6158_v21 = vpack.c.bf16 %v2596_v27, %v2590_v41  ;;  %v8011_v16 = vld [vmem:[%s6695_s7 + $0x180] sm:$0xff]   ;;  %v8014_v41 = vld [vmem:[%s6695_s7 + $0x1c8] sm:$0xff]   ;;  %v8029_v27 = vld [vmem:[%s6695_s7 + $0x1d0] sm:$0xff]   ;;  %9062 = vst [vmem:[#allocation28_spill] sm:$0xff] %v8047_v54 }
 0x1ab   : > { %6139 = vmatprep.subr.bf16.mxu1 %v6138_v19  ;;  %v6154_v46 = vpack.c.bf16 %v9048_v13, %v9047_v28  ;;  %v7997_v60 = vand.u32 4294901760, %v1744_v49  ;;  %v9051_v25 = vand.u32 4294901760, %v7704_v42  ;;  %v9052_v26 = vand.u32 4294901760, %v7706_v36  ;;  %9055 = vst [vmem:[#allocation21_spill] sm:$0xff] %v8011_v16  ;;  %9056 = vst [vmem:[#allocation22_spill] sm:$0xff] %v8014_v41  ;;  %v8023_v36 = vld [vmem:[%s6695_s7 + $0x188] sm:$0xff]  }
 0x1ac   : > { %v5041_v62 = vpop.f32.mrb[8].mxu1  ;;  %v6156_v47 = vpack.c.bf16 %v9050_v17, %v9049_v37  ;;  %9058 = vst [vmem:[#allocation24_spill] sm:$0xff] %v8023_v36  ;;  %9059 = vst [vmem:[#allocation25_spill] sm:$0xff] %v8029_v27  ;;  %v4573_v9 = vunpack.c.l.bf16 %v8023_v36  ;;  %v8070_v59 = vld [vmem:[%s6695_s7 + $0x1e0] sm:$0xff]   ;;  %v8088_v37 = vld [vmem:[%s6695_s7 + $0x1a8] sm:$0xff]  }
 0x1ad   : > { %v5042_v10 = vpop.f32.mrb[9].mxu1  ;;  %v6160_v19 = vpack.c.bf16 %v9052_v26, %v9051_v25  ;;  %v8007_v15 = vsub.f32 %v1744_v49, %v7997_v60  ;;  %9065 = vst [vmem:[#allocation31_spill] sm:$0xff] %v8070_v59  ;;  %9066 = vst [vmem:[#allocation32_spill] sm:$0xff] %v8088_v37  ;;  %v4589_v17 = vunpack.c.l.bf16 %v8088_v37  ;;  %v4360_v25 = vld [vmem:[%s6844_s11 + $0x38] sm:$0xff] }
 0x1ae   : > { %v5043_v2 = vadd.f32 %v5042_v10, %v5041_v62  ;;  %6141 = vmatpush3.bf16.msra.mxu1 %v6140_v7  ;;  %v8004_v62 = vld [vmem:[%s6695_s7 + $0x1c0] sm:$0xff]   ;;  %v4569_v7 = vunpack.c.l.bf16 %v8011_v16 }
 0x1af   : > { %6143 = vmatprep.subr.bf16.mxu1 %v6142_v34  ;;  %9053 = vst [vmem:[#allocation17_spill] sm:$0xff] %v8004_v62  ;;  %9054 = vst [vmem:[#allocation20_spill] sm:$0xff] %v8007_v15  ;;  %v8018_v42 = vand.u32 4294901760, %v8007_v15  ;;  %v8040_v34 = vld [vmem:[%s6695_s7 + $0x190] sm:$0xff]   ;;  %v4602_v28 = vunpack.c.h.bf16 %v8004_v62 }
 0x1b0   : > { %v1528_v40 = vadd.f32 %v5043_v2, %v1452_v56  ;;  %v9043_v56 = vand.u32 4294901760, %v7854_v6  ;;  %v4570_v2 = vunpack.c.h.bf16 %v8011_v16  ;;  %9060 = vst [vmem:[#allocation26_spill] sm:$0xff] %v8040_v34  ;;  %v4577_v18 = vunpack.c.l.bf16 %v8040_v34 }
 0x1b1   : > { %9057 = vst [vmem:[#allocation23_spill] sm:$0xff] %v8018_v42  ;;  %v1815_v20 = vsub.f32 %v8007_v15, %v8018_v42  ;;  %v4578_v11 = vunpack.c.h.bf16 %v8040_v34  ;;  %v8054_v57 = vsub.f32 %v4569_v7, %v4569_v7 }
 0x1b2   : > { %6145 = vmatpush3.bf16.msra.mxu1 %v6144_v44  ;;  %v6150_v43 = vpack.c.bf16 %v9044_v33, %v9043_v56  ;;  %v8060_v56 = vld [vmem:[%s6695_s7 + $0x1a0] sm:$0xff]  }
 0x1b3   : > { %6147 = vmatprep.subr.bf16.mxu1 %v6146_v32  ;;  %v4581_v32 = vunpack.c.l.bf16 %v8047_v54  ;;  %v8052_v23 = vand.u32 4294901760, %v1815_v20  ;;  %9064 = vst [vmem:[#allocation30_spill] sm:$0xff] %v8060_v56  ;;  %v4586_v45 = vunpack.c.h.bf16 %v8060_v56  ;;  %v9067_v20 = vmov 0.0  }
 0x1b5   : > { %9063 = vst [vmem:[#allocation29_spill] sm:$0xff] %v8052_v23  ;;  %v8085_v38 = vsub.f32 %v4581_v32, %v4581_v32  ;;  %v8111_v7 = vsub.f32 %v4586_v45, %v4586_v45  ;;  %v8847_v32 = vand.u32 4294901760, %v8054_v57 }
 0x1b6   : > { %6149 = vmatpush3.bf16.msra.mxu1 %v6148_v12  ;;  %v8056_v12 = vsub.f32 %v4570_v2, %v4570_v2  ;;  %v8114_v2 = vld [vmem:[%s6695_s7 + $0x1e8] sm:$0xff]  }
 0x1b7   : > { %v5076_v48 = vpop.f32.mrb[10].mxu0  ;;  %6151 = vmatprep.subr.bf16.mxu1 %v6150_v43  ;;  %v8062_v43 = vsub.f32 %v4573_v9, %v4573_v9  ;;  %9068 = vst [vmem:[#allocation33_spill] sm:$0xff] %v8114_v2 }
 0x1b8   : > { %v5077_v24 = vpop.f32.mrb[11].mxu0 }
 0x1b9   : > { %v5078_v3 = vadd.f32 %v5077_v24, %v5076_v48  ;;  %v4582_v48 = vunpack.c.h.bf16 %v8047_v54  ;;  %v4585_v24 = vunpack.c.l.bf16 %v8060_v56 }
 0x1ba   : > { %6153 = vmatpush3.bf16.msra.mxu1 %v6152_v1  ;;  %v4601_v1 = vunpack.c.l.bf16 %v8004_v62 }
 0x1bb   : > { %v1664_v6 = vadd.f32 %v5078_v3, %v1528_v40  ;;  %6155 = vmatprep.subr.bf16.mxu1 %v6154_v46  ;;  %v4574_v40 = vunpack.c.h.bf16 %v8023_v36  ;;  %v8081_v46 = vsub.f32 %v4577_v18, %v4577_v18  ;;  %v8124_v18 = vld [vmem:[%s6695_s7 + $0x1b0] sm:$0xff]  }
 0x1bc   : > { %v8093_v49 = vsub.f32 %v4601_v1, %v4601_v1  ;;  %9069 = vst [vmem:[#allocation34_spill] sm:$0xff] %v8124_v18 }
 0x1bd   : > { %v8067_v3 = vsub.f32 %v4574_v40, %v4574_v40 }
 0x1be   : > { %6157 = vmatpush3.bf16.msra.mxu1 %v6156_v47  ;;  %v4590_v47 = vunpack.c.h.bf16 %v8088_v37  ;;  %v8835_v9 = vand.u32 4294901760, %v8093_v49 }
 0x1bf   : > { %6159 = vmatprep.subr.bf16.mxu1 %v6158_v21  ;;  %v8095_v21 = vsub.f32 %v4602_v28, %v4602_v28 }
 0x1c0   : > { %v3177_v45 = vsub.f32 %v8093_v49, %v8835_v9  ;;  %v4359_v9 = vld [vmem:[%s6844_s11 + $0x30] sm:$0xff]  ;;  %s6492_s11 = sshll.u32 %s6602_s10, 4  ;;  %s6493_s11 = int_to_ptr.vmem [resolvable:$false] %s6492_s11 }
 0x1c1   : > { %v8837_v40 = vand.u32 4294901760, %v8095_v21  ;;  %s6494_s12 = scalar_lea.vmem %s6493_s11, 512  ;;  %p6495_p1 = scmp.lt.s32.totalorder %s8631_s30, %s6493_s11 }
 0x1c2   : > { %6161 = vmatpush3.bf16.msra.mxu1 %v6160_v19  ;;  %v8102_v19 = vsub.f32 %v4582_v48, %v4582_v48  ;;  %v8132_v48 = vsub.f32 %v4590_v47, %v4590_v47  ;;  %v3081_v47 = vsub.f32 %v8054_v57, %v8847_v32  ;;  %p6496_p2 = scmp.lt.s32.totalorder %s6494_s12, %s6488_s9 }
 0x1c3   : > { %6195 = vmatprep.subr.bf16.mxu1 %v8004_v62  ;;  %v3183_v1 = vsub.f32 %v8095_v21, %v8837_v40  ;;  %v4594_v40 = vunpack.c.h.bf16 %v8124_v18 }
 0x1c4   : > { %v8881_v58 = vand.u32 4294901760, %v8102_v19  ;;  %p6497_p3 = por %p6496_p2, %p6495_p1 }
 0x1c5   : > { %2921 = vmatmul.mubr.f32.vlgmr.msra.gmra.mrb[16].mxu1 %v7714_v5 }
 0x1c6   : > { %6197 = vmatpush3.bf16.msra.mxu1 %v8011_v16  ;;  %v3082_v16 = vand.u32 4294901760, %v3081_v47  ;;  %v4605_v47 = vunpack.c.l.bf16 %v8014_v41  ;;  %p6498_p5 = pnand %p6497_p3, %p6491_p0 }
 0x1c7   : > { %6199 = vmatprep.subr.bf16.mxu1 %v8014_v41 }
 0x1ca   : > { %6201 = vmatpush3.bf16.msra.mxu1 %v8023_v36  ;;  %v8160_v36 = vld [vmem:[%s6695_s7 + $0x1b8] sm:$0xff]  }
 0x1cb   : > { %6203 = vmatprep.subr.bf16.mxu1 %v8029_v27  ;;  %9072 = vst [vmem:[#allocation37_spill] sm:$0xff] %v8160_v36  ;;  %v4598_v14 = vunpack.c.h.bf16 %v8160_v36 }
 0x1cc   : > { %v5111_v10 = vpop.f32.mrb[10].mxu1 }
 0x1cd   : > { %v5112_v31 = vpop.f32.mrb[11].mxu1 }
 0x1ce   : > { %v5113_v55 = vadd.f32 %v5112_v31, %v5111_v10  ;;  %6205 = vmatpush3.bf16.msra.mxu1 %v8040_v34  ;;  %v8105_v10 = vsub.f32 %v4585_v24, %v4585_v24  ;;  %v8107_v31 = vand.u32 4294901760, %v4360_v25  ;;  %v4593_v24 = vunpack.c.l.bf16 %v8124_v18 }
 0x1cf   : > { %6207 = vmatprep.subr.bf16.mxu1 %v8044_v8 }
 0x1d0   : > { %v1736_v44 = vadd.f32 %v5113_v55, %v1664_v6  ;;  %v8083_v6 = vsub.f32 %v4578_v11, %v4578_v11  ;;  %v8116_v55 = vsub.f32 %v4589_v17, %v4589_v17  ;;  %v8127_v11 = vsub.f32 %v4360_v25, %v8107_v31 }
 0x1d2   : > { %v1739_v33 = vmax.f32 %v1736_v44, 0.0  ;;  %6209 = vmatpush3.bf16.msra.mxu1 %v8047_v54  ;;  %9070 = vst [vmem:[#allocation35_spill] sm:$0xff] %v8127_v11  ;;  %v8854_v17 = vand.u32 4294901760, %v8127_v11  ;;  %v3184_v54 = vand.u32 4294901760, %v3183_v1  ;;  %v8874_v35 = vand.u32 4294901760, %v8083_v6 }
 0x1d3   : > { %6211 = vmatprep.subr.bf16.mxu1 %v8070_v59 }
 0x1d4   : > { %1741 = vst.msk [vmem:[%s8075_s22] sm:$0xff] %vm1740_vm2, %v1739_v33  ;;  %v8079_v13 = vand.u32 4294901760, %v1739_v33  ;;  %v3065_v32 = vsub.f32 %v8127_v11, %v8854_v17  ;;  %v8179_v17 = vsub.f32 %v4594_v40, %v4594_v40  ;;  %v6258_v40 = vpack.c.bf16 %v8095_v21, %v8093_v49 }
 0x1d6   : > { %v8099_v26 = vsub.f32 %v1739_v33, %v8079_v13  ;;  %5559 = vmatpush3.msra.mxu0 %v8079_v13  ;;  %v8852_v33 = vand.u32 4294901760, %v8056_v12  ;;  %6213 = vmatpush3.bf16.msra.mxu1 %v8060_v56  ;;  %v8157_v56 = vsub.f32 %v4593_v24, %v4593_v24  ;;  %v3066_v1 = vand.u32 4294901760, %v3065_v32 }
 0x1d7   : > { %5561 = vmatmul.mubr.f32.vlgmr.msra.gmra.mrb[12].mxu0 %v8052_v23  ;;  %5563 = vmatprep.subr.mxu0 %v9067_v20  ;;  %v8154_v23 = vld [vmem:[%s6695_s7 + $0x1f0] sm:$0xff]   ;;  %v8197_v32 = vsub.f32 %v4605_v47, %v4605_v47 }
 0x1d8   : > { %v8840_v44 = vand.u32 4294901760, %v8099_v26  ;;  %5565 = vmatprep.mubr.msk.f32.mxu0 %vm6601_vm0, %v9067_v20  ;;  %6215 = vmatprep.subr.bf16.mxu1 %v8114_v2  ;;  %v3087_v25 = vsub.f32 %v8056_v12, %v8852_v33  ;;  %9071 = vst [vmem:[#allocation36_spill] sm:$0xff] %v8154_v23  ;;  %v4597_v33 = vunpack.c.l.bf16 %v8160_v36 }
 0x1d9   : > { %3067 = vmatprep.mubr.f32.mxu1 %v3066_v1  ;;  %v8869_v47 = vand.u32 4294901760, %v8197_v32 }
 0x1da   : > { %v1826_v28 = vsub.f32 %v8099_v26, %v8840_v44  ;;  %v3178_v44 = vand.u32 4294901760, %v3177_v45  ;;  %v3088_v62 = vand.u32 4294901760, %v3087_v25  ;;  %6217 = vmatpush3.bf16.msra.mxu1 %v8088_v37  ;;  %v8170_v45 = vand.u32 4294901760, %v4359_v9 }
 0x1db   : > { %6219 = vmatprep.subr.bf16.mxu1 %v8154_v23  ;;  %v4606_v25 = vunpack.c.h.bf16 %v8014_v41  ;;  %v9076_v37 = vand.u32 4294901760, %v8062_v43  ;;  %v4609_v41 = vunpack.c.l.bf16 %v8029_v27  ;;  %v3189_v5 = vsub.f32 %v8197_v32, %v8869_v47 }
 0x1dc   : > { %v1827_v34 = vand.u32 4294901760, %v1826_v28  ;;  %v8168_v24 = vpack.c.bf16 %v3184_v54, %v3178_v44  ;;  %9074 = vst [vmem:[#allocation39_spill] sm:$0xff] %v8170_v45  ;;  %v8173_v28 = vpack.c.bf16 %v3088_v62, %v3082_v16  ;;  %v8182_v54 = vld [vmem:[%s6695_s7 + $0x1f8] sm:$0xff]   ;;  %v8184_v44 = vsub.f32 %v4597_v33, %v4597_v33 }
 0x1dd   : > { %v8193_v16 = vsub.f32 %v4598_v14, %v4598_v14  ;;  %v8865_v33 = vand.u32 4294901760, %v8067_v3  ;;  %v8203_v62 = vsub.f32 %v4606_v25, %v4606_v25  ;;  %v3093_v14 = vsub.f32 %v8062_v43, %v9076_v37 }
 0x1de   : > { %9073 = vst [vmem:[#allocation38_spill] sm:$0xff] %v8168_v24  ;;  %5564 = vmatpush3.msra.mxu0 %v1827_v34  ;;  %9075 = vst [vmem:[#allocation40_spill] sm:$0xff] %v8173_v28  ;;  %v8187_v34 = vsub.f32 %v4359_v9, %v8170_v45  ;;  %6221 = vmatpush3.bf16.msra.mxu1 %v8124_v18  ;;  %v4610_v18 = vunpack.c.h.bf16 %v8029_v27  ;;  %v6260_v37 = vpack.c.bf16 %v8056_v12, %v8054_v57 }
 0x1df   : > { %5566 = vmatmul.mubr.f32.vlgmr.msra.gmra.mrb[12].mxu0 %v7997_v60  ;;  %5568 = vmatprep.subr.mxu0 %v9067_v20  ;;  %v3099_v28 = vsub.f32 %v8067_v3, %v8865_v33  ;;  %v8870_v45 = vand.u32 4294901760, %v8203_v62  ;;  %v3094_v1 = vand.u32 4294901760, %v3093_v14  ;;  %v6262_v33 = vpack.c.bf16 %v8203_v62, %v8197_v32 }
 0x1e0   : > { %5569 = vmatpush3.msra.mxu0 %v8099_v26  ;;  %5570 = vmatprep.mubr.msk.f32.mxu0 %vm6601_vm0, %v9067_v20  ;;  %v8868_v9 = vand.u32 4294901760, %v8187_v34  ;;  %v8227_v27 = vsub.f32 %v4609_v41, %v4609_v41  ;;  %v8233_v30 = vsub.f32 %v4610_v18, %v4610_v18  ;;  %v9077_v14 = vand.u32 4294901760, %v8081_v46 }
 0x1e1   : > { %5573 = vmatprep.subr.mxu0 %v9067_v20  ;;  %6223 = vmatprep.subr.bf16.mxu1 %v8182_v54  ;;  %v3100_v29 = vand.u32 4294901760, %v3099_v28  ;;  %v3190_v28 = vand.u32 4294901760, %v3189_v5 }
 0x1e2   : > { %v3071_v24 = vsub.f32 %v8187_v34, %v8868_v9  ;;  %6225 = vmatpush3.bf16.msra.mxu1 %v8160_v36  ;;  %v3195_v9 = vsub.f32 %v8203_v62, %v8870_v45  ;;  %v3105_v50 = vsub.f32 %v8081_v46, %v9077_v14  ;;  %v8873_v41 = vand.u32 4294901760, %v8227_v27 }
 0x1e3   : > { %6259 = vmatprep.subr.bf16.mxu1 %v6258_v40  ;;  %v8238_v47 = vpack.c.bf16 %v3100_v29, %v3094_v1  ;;  %v6264_v45 = vpack.c.bf16 %v8067_v3, %v8062_v43  ;;  %v8876_v18 = vand.u32 4294901760, %v8233_v30  ;;  %v3111_v29 = vsub.f32 %v8083_v6, %v8874_v35 }
 0x1e4   : > { %v3072_v25 = vand.u32 4294901760, %v3071_v24  ;;  %v3196_v24 = vand.u32 4294901760, %v3195_v9  ;;  %v3106_v36 = vand.u32 4294901760, %v3105_v50  ;;  %v3201_v5 = vsub.f32 %v8227_v27, %v8873_v41 }
 0x1e5   : > { %9078 = vst [vmem:[#allocation41_spill] sm:$0xff] %v8238_v47  ;;  %v6266_v40 = vpack.c.bf16 %v8233_v30, %v8227_v27  ;;  %v4613_v9 = vunpack.c.l.bf16 %v8044_v8  ;;  %v3207_v1 = vsub.f32 %v8233_v30, %v8876_v18  ;;  %v4614_v14 = vunpack.c.h.bf16 %v8044_v8 }
 0x1e6   : > { %3073 = vmatmul.mubr.f32.vlgmr.msra.gmra.mrb[18].mxu1 %v3072_v25  ;;  %v8259_v50 = vpack.c.bf16 %v3196_v24, %v3190_v28  ;;  %v8879_v41 = vand.u32 4294901760, %v8085_v38  ;;  %v3202_v35 = vand.u32 4294901760, %v3201_v5  ;;  %v4617_v18 = vunpack.c.l.bf16 %v8070_v59 }
 0x1e7   : > { %5571 = vmatmul.mubr.f32.vlgmr.msra.gmra.mrb[12].mxu0 %v8007_v15  ;;  %6261 = vmatpush3.bf16.msra.mxu1 %v6260_v37  ;;  %v3112_v15 = vand.u32 4294901760, %v3111_v29  ;;  %v8266_v47 = vsub.f32 %v4613_v9, %v4613_v9  ;;  %v3208_v25 = vand.u32 4294901760, %v3207_v1  ;;  %v8270_v28 = vsub.f32 %v4614_v14, %v4614_v14 }
 0x1e8   : > { %5574 = vmatpush3.msra.mxu0 %v8079_v13  ;;  %5575 = vmatprep.mubr.msk.f32.mxu0 %vm6601_vm0, %v9067_v20  ;;  %v3117_v24 = vsub.f32 %v8085_v38, %v8879_v41  ;;  %v6268_v37 = vpack.c.bf16 %v8083_v6, %v8081_v46  ;;  %v4618_v41 = vunpack.c.h.bf16 %v8070_v59 }
 0x1e9   : > { %5578 = vmatprep.subr.mxu0 %v9067_v20  ;;  %3376 = vmatprep.mubr.f32.mxu1 %v8127_v11  ;;  %v8276_v8 = vpack.c.bf16 %v3112_v15, %v3106_v36  ;;  %v8882_v5 = vand.u32 4294901760, %v8266_v47  ;;  %v8284_v29 = vpack.c.bf16 %v3208_v25, %v3202_v35  ;;  %v8883_v9 = vand.u32 4294901760, %v8270_v28 }
 0x1ea   : > { %6263 = vmatprep.subr.bf16.mxu1 %v6262_v33  ;;  %v3123_v33 = vsub.f32 %v8102_v19, %v8881_v58  ;;  %v3118_v1 = vand.u32 4294901760, %v3117_v24  ;;  %v6270_v14 = vpack.c.bf16 %v8270_v28, %v8266_v47  ;;  %v8293_v11 = vsub.f32 %v4617_v18, %v4617_v18 }
 0x1eb   : > { %9079 = vst [vmem:[#allocation42_spill] sm:$0xff] %v8276_v8  ;;  %9080 = vst [vmem:[#allocation43_spill] sm:$0xff] %v8284_v29  ;;  %6265 = vmatpush3.bf16.msra.mxu1 %v6264_v45  ;;  %v3213_v15 = vsub.f32 %v8266_v47, %v8882_v5  ;;  %v3219_v35 = vsub.f32 %v8270_v28, %v8883_v9  ;;  %v8885_v25 = vand.u32 4294901760, %v8105_v10  ;;  %v4621_v24 = vunpack.c.l.bf16 %v8114_v2 }
 0x1ec   : > { %v3124_v36 = vand.u32 4294901760, %v3123_v33  ;;  %6267 = vmatprep.subr.bf16.mxu1 %v6266_v40  ;;  %v9081_v58 = vand.u32 4294901760, %v8099_v26  ;;  %v8888_v40 = vand.u32 4294901760, %v8293_v11  ;;  %v8309_v5 = vsub.f32 %v4618_v41, %v4618_v41 }
 0x1ed   : > { %v3214_v18 = vand.u32 4294901760, %v3213_v15  ;;  %v3220_v9 = vand.u32 4294901760, %v3219_v35  ;;  %v6272_v45 = vpack.c.bf16 %v8102_v19, %v8085_v38  ;;  %v9083_v26 = vand.u32 4294901760, %v8111_v7 }
 0x1ee   : > { %v8306_v33 = vpack.c.bf16 %v3124_v36, %v3118_v1  ;;  %v3225_v41 = vsub.f32 %v8293_v11, %v8888_v40  ;;  %v8892_v1 = vand.u32 4294901760, %v8309_v5  ;;  %v6274_v36 = vpack.c.bf16 %v8309_v5, %v8293_v11 }
 0x1ef   : > { %5576 = vmatmul.mubr.f32.vlgmr.msra.gmra.mrb[12].mxu0 %v8018_v42  ;;  %v3135_v15 = vsub.f32 %v8111_v7, %v9083_v26  ;;  %6269 = vmatpush3.bf16.msra.mxu1 %v6268_v37  ;;  %v4622_v35 = vunpack.c.h.bf16 %v8114_v2  ;;  %v8327_v42 = vpack.c.bf16 %v3220_v9, %v3214_v18  ;;  %v8889_v8 = vand.u32 4294901760, %v8116_v55 }
 0x1f0   : > { %5579 = vmatpush3.msra.mxu0 %v9081_v58  ;;  %5580 = vmatprep.mubr.msk.f32.mxu0 %vm6601_vm0, %v9067_v20  ;;  %9082 = vst [vmem:[#allocation44_spill] sm:$0xff] %v8306_v33  ;;  %v3129_v58 = vsub.f32 %v8105_v10, %v8885_v25  ;;  %v8329_v33 = vsub.f32 %v4621_v24, %v4621_v24  ;;  %v3226_v26 = vand.u32 4294901760, %v3225_v41  ;;  %v8891_v18 = vand.u32 4294901760, %v8132_v48 }
 0x1f1   : > { %5583 = vmatprep.subr.mxu0 %v9067_v20  ;;  %6271 = vmatprep.subr.bf16.mxu1 %v6270_v14  ;;  %v3136_v59 = vand.u32 4294901760, %v3135_v15  ;;  %v3231_v37 = vsub.f32 %v8309_v5, %v8892_v1  ;;  %v8334_v40 = vsub.f32 %v4622_v35, %v4622_v35  ;;  %v6276_v9 = vpack.c.bf16 %v8111_v7, %v8105_v10 }
 0x1f2   : > { %v3130_v25 = vand.u32 4294901760, %v3129_v58  ;;  %v8890_v14 = vand.u32 4294901760, %v8329_v33  ;;  %v3141_v15 = vsub.f32 %v8116_v55, %v8889_v8  ;;  %v4626_v35 = vunpack.c.h.bf16 %v8154_v23 }
 0x1f3   : > { %6273 = vmatpush3.bf16.msra.mxu1 %v6272_v45  ;;  %v3232_v24 = vand.u32 4294901760, %v3231_v37  ;;  %v8897_v58 = vand.u32 4294901760, %v8334_v40  ;;  %v6278_v41 = vpack.c.bf16 %v8334_v40, %v8329_v33  ;;  %v4625_v45 = vunpack.c.l.bf16 %v8154_v23 }
 0x1f4   : > { %v8337_v29 = vpack.c.bf16 %v3136_v59, %v3130_v25  ;;  %6275 = vmatprep.subr.bf16.mxu1 %v6274_v36  ;;  %v3237_v59 = vsub.f32 %v8329_v33, %v8890_v14  ;;  %v3147_v25 = vsub.f32 %v8132_v48, %v8891_v18  ;;  %v3142_v8 = vand.u32 4294901760, %v3141_v15 }
 0x1f5   : > { %v8361_v37 = vpack.c.bf16 %v3232_v24, %v3226_v26  ;;  %v3243_v36 = vsub.f32 %v8334_v40, %v8897_v58  ;;  %v8899_v14 = vand.u32 4294901760, %v8157_v56  ;;  %v8368_v2 = vsub.f32 %v4625_v45, %v4625_v45 }
 0x1f6   : > { %v3238_v18 = vand.u32 4294901760, %v3237_v59  ;;  %v3148_v1 = vand.u32 4294901760, %v3147_v25  ;;  %v8370_v23 = vsub.f32 %v4626_v35, %v4626_v35  ;;  %v6280_v26 = vpack.c.bf16 %v8132_v48, %v8116_v55 }
 0x1f7   : > { %5581 = vmatmul.mubr.f32.vlgmr.msra.gmra.mrb[12].mxu0 %v7997_v60  ;;  %6277 = vmatpush3.bf16.msra.mxu1 %v6276_v9  ;;  %v3153_v24 = vsub.f32 %v8157_v56, %v8899_v14  ;;  %v8898_v15 = vand.u32 4294901760, %v8179_v17  ;;  %v8902_v14 = vand.u32 4294901760, %v8193_v16 }
 0x1f8   : > { %5584 = vmatpush3.msra.mxu0 %v8079_v13  ;;  %5585 = vmatprep.mubr.msk.f32.mxu0 %vm6601_vm0, %v9067_v20  ;;  %v3244_v13 = vand.u32 4294901760, %v3243_v36  ;;  %v8378_v58 = vpack.c.bf16 %v3148_v1, %v3142_v8  ;;  %v8901_v59 = vand.u32 4294901760, %v8370_v23  ;;  %v6282_v9 = vpack.c.bf16 %v8370_v23, %v8368_v2 }
 0x1f9   : > { %6035 = vmatprep.subr.bf16.mxu0 %v7718_v52  ;;  %6279 = vmatprep.subr.bf16.mxu1 %v6278_v41  ;;  %v8900_v52 = vand.u32 4294901760, %v8368_v2  ;;  %v3154_v45 = vand.u32 4294901760, %v3153_v24  ;;  %v3159_v35 = vsub.f32 %v8179_v17, %v8898_v15  ;;  %v4629_v36 = vunpack.c.l.bf16 %v8182_v54 }
 0x1fa   : > { %9084 = vst [vmem:[#allocation45_spill] sm:$0xff] %v8378_v58  ;;  %v8384_v25 = vpack.c.bf16 %v3244_v13, %v3238_v18  ;;  %v3255_v1 = vsub.f32 %v8370_v23, %v8901_v59  ;;  %v4630_v41 = vunpack.c.h.bf16 %v8182_v54  ;;  %v8903_v18 = vand.u32 4294901760, %v8184_v44 }
 0x1fb   : > { %v3249_v8 = vsub.f32 %v8368_v2, %v8900_v52  ;;  %6281 = vmatpush3.bf16.msra.mxu1 %v6280_v26  ;;  %v3160_v13 = vand.u32 4294901760, %v3159_v35  ;;  %v6284_v24 = vpack.c.bf16 %v8179_v17, %v8157_v56  ;;  %v8400_v15 = vsub.f32 %v4629_v36, %v4629_v36 }
 0x1fc   : > { %9085 = vst [vmem:[#allocation46_spill] sm:$0xff] %v8384_v25  ;;  %v3256_v58 = vand.u32 4294901760, %v3255_v1  ;;  %6283 = vmatprep.subr.bf16.mxu1 %v6282_v9  ;;  %v8404_v25 = vsub.f32 %v4630_v41, %v4630_v41  ;;  %v3165_v59 = vsub.f32 %v8184_v44, %v8903_v18  ;;  %v3171_v36 = vsub.f32 %v8193_v16, %v8902_v14 }
 0x1fd   : > { %v3250_v52 = vand.u32 4294901760, %v3249_v8  ;;  %v8411_v26 = vpack.c.bf16 %v3160_v13, %v3154_v45  ;;  %v8904_v35 = vand.u32 4294901760, %v8400_v15  ;;  %v6288_v13 = vpack.c.bf16 %v8193_v16, %v8184_v44 }
 0x1fe   : > { %v3266_v8 = vand.u32 4294901760, %v8404_v25  ;;  %v3166_v1 = vand.u32 4294901760, %v3165_v59  ;;  %v3172_v41 = vand.u32 4294901760, %v3171_v36  ;;  %v9088_v36 = vand.u32 4294901760, %v8054_v57 }
 0x1ff   : > { %5586 = vmatmul.mubr.f32.vlgmr.msra.gmra.mrb[12].mxu0 %v7997_v60  ;;  %v8418_v9 = vpack.c.bf16 %v3256_v58, %v3250_v52  ;;  %6285 = vmatpush3.bf16.msra.mxu1 %v6284_v24  ;;  %v3261_v45 = vsub.f32 %v8400_v15, %v8904_v35  ;;  %v9087_v58 = vand.u32 4294901760, %v8095_v21  ;;  %v9089_v35 = vand.u32 4294901760, %v8056_v12 }
 0x200   : > { %6037 = vmatpush3.bf16.msra.mxu0 %v7737_v39  ;;  %2601 = vmatprep.mubr.f32.mxu0 %v7672_v22  ;;  %v6286_v39 = vpack.c.bf16 %v8404_v25, %v8400_v15  ;;  %v3267_v14 = vsub.f32 %v8404_v25, %v3266_v8  ;;  %v8434_v24 = vpack.c.bf16 %v3172_v41, %v3166_v1  ;;  %v9091_v21 = vand.u32 4294901760, %v8203_v62 }
 0x201   : > { %6039 = vmatprep.subr.bf16.mxu0 %v7766_v53  ;;  %v9086_v53 = vand.u32 4294901760, %v8093_v49  ;;  %v3262_v59 = vand.u32 4294901760, %v3261_v45  ;;  %v6324_v25 = vpack.c.bf16 %v9089_v35, %v9088_v36  ;;  %v9090_v49 = vand.u32 4294901760, %v8197_v32 }
 0x202   : > { %6287 = vmatprep.subr.bf16.mxu1 %v6286_v39  ;;  %v3268_v18 = vand.u32 4294901760, %v3267_v14  ;;  %v9093_v57 = vand.u32 4294901760, %v8067_v3  ;;  %v9094_v32 = vand.u32 4294901760, %v8227_v27  ;;  %v9095_v62 = vand.u32 4294901760, %v8233_v30  ;;  %v9101_v27 = vld [vmem:[#allocation8_spill] sm:$0xff]  ;;  %v9102_v30 = vld [vmem:[#allocation11_spill] sm:$0xff] }
 0x203   : > { %v6322_v52 = vpack.c.bf16 %v9087_v58, %v9086_v53  ;;  %6289 = vmatpush3.bf16.msra.mxu1 %v6288_v13  ;;  %v9099_v3 = vand.u32 4294901760, %v8266_v47  ;;  %v9100_v35 = vand.u32 4294901760, %v8270_v28  ;;  %v9104_v45 = vand.u32 4294901760, %v8102_v19  ;;  %v9107_v13 = vld [vmem:[#allocation14_spill] sm:$0xff]  ;;  %v9108_v28 = vld [vmem:[#allocation13_spill] sm:$0xff] }
 0x204   : > { %6041 = vmatpush3.bf16.msra.mxu0 %v7761_v63  ;;  %v8441_v39 = vpack.c.bf16 %v3268_v18, %v3262_v59  ;;  %v6326_v63 = vpack.c.bf16 %v9091_v21, %v9090_v49  ;;  %v6330_v14 = vpack.c.bf16 %v9095_v62, %v9094_v32  ;;  %v9109_v53 = vand.u32 4294901760, %v8105_v10  ;;  %v9113_v59 = vld [vmem:[#allocation16_spill] sm:$0xff]  ;;  %v6472_v21 = vld [vmem:[%s6695_s7 + $0x140] sm:$0xff]  }
 0x205   : > { %6043 = vmatprep.subr.bf16.mxu0 %v7819_v0  ;;  %6323 = vmatprep.subr.bf16.mxu1 %v6322_v52  ;;  %v9092_v0 = vand.u32 4294901760, %v8062_v43  ;;  %v9098_v43 = vand.u32 4294901760, %v8083_v6  ;;  %v6334_v1 = vpack.c.bf16 %v9100_v35, %v9099_v3  ;;  %v9106_v6 = vand.u32 4294901760, %v8309_v5  ;;  %v9114_v5 = vld [vmem:[#allocation15_spill] sm:$0xff]  ;;  %v6474_v62 = vld [vmem:[%s6695_s7 + $0x148] sm:$0xff]  }
 0x206   : > { %3379 = vmatmul.mubr.f32.vlgmr.msra.gmra.mrb[20].mxu1 %v8187_v34  ;;  %v9110_v58 = vand.u32 4294901760, %v8111_v7  ;;  %v9111_v19 = vand.u32 4294901760, %v8329_v33  ;;  %v9112_v52 = vand.u32 4294901760, %v8334_v40  ;;  %v9115_v36 = vand.u32 4294901760, %v8116_v55  ;;  %v9119_v40 = vld [vmem:[#allocation18_spill] sm:$0xff]  ;;  %v6482_v3 = vld [vmem:[%s6695_s7 + $0x168] sm:$0xff]  }
 0x207   : > { %6325 = vmatpush3.bf16.msra.mxu1 %v6324_v25  ;;  %v6328_v12 = vpack.c.bf16 %v9093_v57, %v9092_v0  ;;  %3589 = vmatprep.mubr.f32.mxu1 %v8107_v31  ;;  %v9116_v10 = vand.u32 4294901760, %v8132_v48  ;;  %v9117_v7 = vand.u32 4294901760, %v8368_v2  ;;  %v9118_v33 = vand.u32 4294901760, %v8370_v23  ;;  %v9122_v48 = vld [vmem:[#allocation12_spill] sm:$0xff]  ;;  %v6473_v57 = vld [vmem:[%s6695_s7 + $0x100] sm:$0xff]  }
 0x208   : > { %6045 = vmatpush3.bf16.msra.mxu0 %v7805_v4  ;;  %6327 = vmatprep.subr.bf16.mxu1 %v6326_v63  ;;  %v9096_v4 = vld [vmem:[#allocation10_spill] sm:$0xff]  ;;  %v9120_v63 = vand.u32 4294901760, %v8157_v56  ;;  %v9121_v55 = vand.u32 4294901760, %v8179_v17  ;;  %v9123_v2 = vand.u32 4294901760, %v8400_v15  ;;  %v9126_v56 = vand.u32 4294901760, %v8184_v44  ;;  %v6475_v15 = vld [vmem:[%s6695_s7 + $0x108] sm:$0xff]  }
 0x209   : > { %6047 = vmatprep.subr.bf16.mxu0 %v7831_v61  ;;  %v9097_v61 = vand.u32 4294901760, %v8081_v46  ;;  %v9105_v46 = vand.u32 4294901760, %v8293_v11  ;;  %v6342_v11 = vpack.c.bf16 %v9112_v52, %v9111_v19  ;;  %v6344_v25 = vpack.c.bf16 %v9116_v10, %v9115_v36  ;;  %v9128_v44 = vld [vmem:[#allocation39_spill] sm:$0xff]  ;;  %v6483_v35 = vld [vmem:[%s6695_s7 + $0x128] sm:$0xff]   ;;  %v9137_v19 = vld [vmem:[#allocation46_spill] sm:$0xff] }
 0x20a   : > { %v6346_v49 = vpack.c.bf16 %v9118_v33, %v9117_v7  ;;  %v6348_v0 = vpack.c.bf16 %v9121_v55, %v9120_v63  ;;  %v6350_v23 = vpack.c.bf16 %v3266_v8, %v9123_v2  ;;  %v9127_v17 = vand.u32 4294901760, %v8193_v16  ;;  %v6476_v8 = vld [vmem:[%s6695_s7 + $0x150] sm:$0xff]   ;;  %v6479_v16 = vld [vmem:[%s6695_s7 + $0x118] sm:$0xff]   ;;  %v9148_v10 = vld [vmem:[#allocation28_spill] sm:$0xff] }
 0x20b   : > { %6329 = vmatpush3.bf16.msra.mxu1 %v6328_v12  ;;  %v6332_v18 = vpack.c.bf16 %v9098_v43, %v9097_v61  ;;  %v6338_v47 = vpack.c.bf16 %v9106_v6, %v9105_v46  ;;  %v9124_v12 = vld [vmem:[#allocation9_spill] sm:$0xff]  ;;  %v6478_v61 = vld [vmem:[%s6695_s7 + $0x158] sm:$0xff]   ;;  %v6480_v43 = vld [vmem:[%s6695_s7 + $0x160] sm:$0xff]   ;;  %v9156_v2 = vand.u32 4294901760, %v8187_v34 }
 0x20c   : > { %6049 = vmatpush3.bf16.msra.mxu0 %v7826_v51  ;;  %6331 = vmatprep.subr.bf16.mxu1 %v6330_v14  ;;  %v9103_v51 = vand.u32 4294901760, %v8085_v38  ;;  %v6340_v38 = vpack.c.bf16 %v9110_v58, %v9109_v53  ;;  %v9125_v32 = vand.u32 4294901760, %v9124_v12  ;;  %v6352_v14 = vpack.c.bf16 %v9127_v17, %v9126_v56  ;;  %v9134_v53 = vld [vmem:[#allocation43_spill] sm:$0xff]  ;;  %v9135_v58 = vld [vmem:[#allocation42_spill] sm:$0xff]  ;;  %v9138_v52 = vld [vmem:[#allocation45_spill] sm:$0xff] }
 0x20d   : > { %6051 = vmatprep.subr.bf16.mxu0 %v9096_v4  ;;  %v6477_v4 = vld [vmem:[%s6695_s7 + $0x110] sm:$0xff]   ;;  %v9143_v36 = vld [vmem:[#allocation22_spill] sm:$0xff] }
 0x20e   : > { %v6336_v41 = vpack.c.bf16 %v9104_v45, %v9103_v51  ;;  %v6487_v51 = vld [vmem:[%s6695_s7 + $0x138] sm:$0xff]   ;;  %v9129_v45 = vld [vmem:[#allocation19_spill] sm:$0xff]  ;;  %v9151_v33 = vld [vmem:[#allocation33_spill] sm:$0xff] }
 0x20f   : > { %6333 = vmatpush3.bf16.msra.mxu1 %v6332_v18  ;;  %v6481_v18 = vld [vmem:[%s6695_s7 + $0x120] sm:$0xff]   ;;  %v9150_v7 = vld [vmem:[#allocation30_spill] sm:$0xff]  ;;  %v9155_v55 = vld [vmem:[#allocation37_spill] sm:$0xff] }
 0x210   : > { %6053 = vmatpush3.bf16.msra.mxu0 %v9101_v27  ;;  %6335 = vmatprep.subr.bf16.mxu1 %v6334_v1  ;;  %v6484_v1 = vld [vmem:[%s6695_s7 + $0x170] sm:$0xff]  }
 0x211   : > { %6055 = vmatprep.subr.bf16.mxu0 %v9102_v30  ;;  %v6485_v27 = vld [vmem:[%s6695_s7 + $0x130] sm:$0xff]   ;;  %v6486_v30 = vld [vmem:[%s6695_s7 + $0x178] sm:$0xff]   ;;  %s8629_s7 = scalar_lea.hbm %s8718_s4, %s4374_s29 }
 0x213   : > { %6337 = vmatpush3.bf16.msra.mxu1 %v6336_v41  ;;  %v9130_v41 = vand.u32 4294901760, %v9129_v45 }
 0x214   : > { %6057 = vmatpush3.bf16.msra.mxu0 %v9107_v13  ;;  %6339 = vmatprep.subr.bf16.mxu1 %v6338_v47  ;;  %v9131_v13 = vld [vmem:[#allocation38_spill] sm:$0xff] }
 0x215   : > { %6059 = vmatprep.subr.bf16.mxu0 %v9108_v28  ;;  %v9133_v28 = vld [vmem:[#allocation41_spill] sm:$0xff] }
 0x217   : > { %6341 = vmatpush3.bf16.msra.mxu1 %v6340_v38  ;;  %v9136_v38 = vld [vmem:[#allocation44_spill] sm:$0xff] }
 0x218   : > { %6061 = vmatpush3.bf16.msra.mxu0 %v9113_v59  ;;  %6343 = vmatprep.subr.bf16.mxu1 %v6342_v11  ;;  %v9139_v11 = vld [vmem:[#allocation17_spill] sm:$0xff] }
 0x219   : > { %6063 = vmatprep.subr.bf16.mxu0 %v9114_v5 }
 0x21b   : > { %6345 = vmatpush3.bf16.msra.mxu1 %v6344_v25  ;;  %v9149_v25 = vld [vmem:[#allocation31_spill] sm:$0xff] }
 0x21c   : > { %6065 = vmatpush3.bf16.msra.mxu0 %v9119_v40  ;;  %6347 = vmatprep.subr.bf16.mxu1 %v6346_v49  ;;  %v9152_v49 = vld [vmem:[#allocation32_spill] sm:$0xff] }
 0x21d   : > { %6099 = vmatprep.subr.bf16.mxu0 %v6472_v21  ;;  %v9153_v40 = vld [vmem:[#allocation36_spill] sm:$0xff] }
 0x21f   : > { %2603 = vmatmul.mubr.f32.vlgmr.msra.gmra.mrb[14].mxu0 %v9122_v48  ;;  %6349 = vmatpush3.bf16.msra.mxu1 %v6348_v0 }
 0x220   : > { %6101 = vmatpush3.bf16.msra.mxu0 %v6473_v57  ;;  %2781 = vmatprep.mubr.f32.mxu0 %v9125_v32 }
 0x221   : > { %6103 = vmatprep.subr.bf16.mxu0 %v6474_v62  ;;  %6351 = vmatprep.subr.bf16.mxu1 %v6350_v23 }
 0x223   : > { %6353 = vmatpush3.bf16.msra.mxu1 %v6352_v14 }
 0x224   : > { %6105 = vmatpush3.bf16.msra.mxu0 %v6475_v15  ;;  %5588 = vmatprep.subr.mxu1 %v9067_v20 }
 0x225   : > { %6107 = vmatprep.subr.bf16.mxu0 %v6476_v8 }
 0x226   : > { %3591 = vmatmul.mubr.f32.vlgmr.msra.gmra.mrb[22].mxu1 %v9128_v44 }
 0x227   : > { %5590 = vmatprep.mubr.msk.f32.mxu1 %vm6601_vm0, %v9067_v20 }
 0x228   : > { %6109 = vmatpush3.bf16.msra.mxu0 %v6477_v4 }
 0x229   : > { %6111 = vmatprep.subr.bf16.mxu0 %v6478_v61 }
 0x22c   : > { %6113 = vmatpush3.bf16.msra.mxu0 %v6479_v16 }
 0x22d   : > { %6115 = vmatprep.subr.bf16.mxu0 %v6480_v43 }
 0x230   : > { %6117 = vmatpush3.bf16.msra.mxu0 %v6481_v18 }
 0x231   : > { %6119 = vmatprep.subr.bf16.mxu0 %v6482_v3 }
 0x234   : > { %6121 = vmatpush3.bf16.msra.mxu0 %v6483_v35 }
 0x235   : > { %6123 = vmatprep.subr.bf16.mxu0 %v6484_v1 }
 0x238   : > { %6125 = vmatpush3.bf16.msra.mxu0 %v6485_v27 }
 0x239   : > { %6127 = vmatprep.subr.bf16.mxu0 %v6486_v30 }
 0x23c   : > { %6129 = vmatpush3.bf16.msra.mxu0 %v6487_v51 }
 0x23d   : > { %6163 = vmatprep.subr.bf16.mxu0 %v6472_v21  ;;  %v9154_v21 = vld [vmem:[#allocation34_spill] sm:$0xff] }
 0x23f   : > { %2785 = vmatmul.mubr.f32.vlgmr.msra.gmra.mrb[16].mxu0 %v9130_v41 }
 0x240   : > { %6165 = vmatpush3.bf16.msra.mxu0 %v6473_v57  ;;  %2991 = vmatprep.mubr.f32.mxu0 %v7672_v22  ;;  %v9132_v22 = vld [vmem:[#allocation40_spill] sm:$0xff] }
 0x241   : > { %6167 = vmatprep.subr.bf16.mxu0 %v6474_v62 }
 0x244   : > { %6169 = vmatpush3.bf16.msra.mxu0 %v6475_v15 }
 0x245   : > { %6171 = vmatprep.subr.bf16.mxu0 %v6476_v8 }
 0x248   : > { %6173 = vmatpush3.bf16.msra.mxu0 %v6477_v4 }
 0x249   : > { %6175 = vmatprep.subr.bf16.mxu0 %v6478_v61 }
 0x24c   : > { %6177 = vmatpush3.bf16.msra.mxu0 %v6479_v16 }
 0x24d   : > { %6179 = vmatprep.subr.bf16.mxu0 %v6480_v43 }
 0x250   : > { %6181 = vmatpush3.bf16.msra.mxu0 %v6481_v18 }
 0x251   : > { %6183 = vmatprep.subr.bf16.mxu0 %v6482_v3 }
 0x254   : > { %6185 = vmatpush3.bf16.msra.mxu0 %v6483_v35 }
 0x255   : > { %6187 = vmatprep.subr.bf16.mxu0 %v6484_v1 }
 0x257   : > { %v5158_v46 = vpop.f32.mrb[12].mxu1 }
 0x258   : > { %6189 = vmatpush3.bf16.msra.mxu0 %v6485_v27  ;;  %v5159_v6 = vpop.f32.mrb[13].mxu1 }
 0x259   : > { %6191 = vmatprep.subr.bf16.mxu0 %v6486_v30  ;;  %v8536_v47 = vadd.f32 %v5159_v6, %v5158_v46 }
 0x25c   : > { %6193 = vmatpush3.bf16.msra.mxu0 %v6487_v51 }
 0x25d   : > { %6227 = vmatprep.subr.bf16.mxu0 %v9131_v13 }
 0x25f   : > { %2993 = vmatmul.mubr.f32.vlgmr.msra.gmra.mrb[18].mxu0 %v9122_v48 }
 0x260   : > { %6229 = vmatpush3.bf16.msra.mxu0 %v9132_v22  ;;  %3271 = vmatprep.mubr.f32.mxu0 %v8107_v31 }
 0x261   : > { %6231 = vmatprep.subr.bf16.mxu0 %v8259_v50 }
 0x264   : > { %6233 = vmatpush3.bf16.msra.mxu0 %v9133_v28 }
 0x265   : > { %6235 = vmatprep.subr.bf16.mxu0 %v9134_v53 }
 0x268   : > { %6237 = vmatpush3.bf16.msra.mxu0 %v9135_v58 }
 0x269   : > { %6239 = vmatprep.subr.bf16.mxu0 %v8327_v42 }
 0x26c   : > { %6241 = vmatpush3.bf16.msra.mxu0 %v9136_v38 }
 0x26d   : > { %6243 = vmatprep.subr.bf16.mxu0 %v8361_v37  ;;  %v9141_v37 = vld [vmem:[#allocation35_spill] sm:$0xff] }
 0x26e   : > { %v9142_v5 = vand.u32 4294901760, %v9141_v37  ;;  %v9157_v37 = vld [vmem:[#allocation29_spill] sm:$0xff] }
 0x270   : > { %6245 = vmatpush3.bf16.msra.mxu0 %v8337_v29  ;;  %v9140_v29 = vld [vmem:[#allocation21_spill] sm:$0xff] }
 0x271   : > { %6247 = vmatprep.subr.bf16.mxu0 %v9137_v19 }
 0x274   : > { %6249 = vmatpush3.bf16.msra.mxu0 %v9138_v52 }
 0x275   : > { %6251 = vmatprep.subr.bf16.mxu0 %v8418_v9  ;;  %v9144_v9 = vld [vmem:[#allocation24_spill] sm:$0xff] }
 0x278   : > { %6253 = vmatpush3.bf16.msra.mxu0 %v8411_v26  ;;  %v5228_v50 = vpop.f32.mrb[14].mxu1  ;;  %v9145_v26 = vld [vmem:[#allocation25_spill] sm:$0xff] }
 0x279   : > { %6255 = vmatprep.subr.bf16.mxu0 %v8441_v39  ;;  %v5229_v42 = vpop.f32.mrb[15].mxu1  ;;  %v9146_v39 = vld [vmem:[#allocation26_spill] sm:$0xff] }
 0x27a   : > { %v5230_v59 = vadd.f32 %v5229_v42, %v5228_v50 }
 0x27c   : > { %6257 = vmatpush3.bf16.msra.mxu0 %v8434_v24  ;;  %v9147_v24 = vld [vmem:[#allocation27_spill] sm:$0xff] }
 0x27d   : > { %6291 = vmatprep.subr.bf16.mxu0 %v9139_v11 }
 0x27f   : > { %3273 = vmatmul.mubr.f32.vlgmr.msra.gmra.mrb[20].mxu0 %v9128_v44 }
 0x280   : > { %6293 = vmatpush3.bf16.msra.mxu0 %v9140_v29  ;;  %3451 = vmatprep.mubr.f32.mxu0 %v9142_v5 }
 0x281   : > { %6295 = vmatprep.subr.bf16.mxu0 %v9143_v36 }
 0x284   : > { %6297 = vmatpush3.bf16.msra.mxu0 %v9144_v9 }
 0x285   : > { %6299 = vmatprep.subr.bf16.mxu0 %v9145_v26 }
 0x288   : > { %6301 = vmatpush3.bf16.msra.mxu0 %v9146_v39 }
 0x289   : > { %6303 = vmatprep.subr.bf16.mxu0 %v9147_v24 }
 0x28c   : > { %6305 = vmatpush3.bf16.msra.mxu0 %v9148_v10 }
 0x28d   : > { %6307 = vmatprep.subr.bf16.mxu0 %v9149_v25 }
 0x290   : > { %6309 = vmatpush3.bf16.msra.mxu0 %v9150_v7 }
 0x291   : > { %6311 = vmatprep.subr.bf16.mxu0 %v9151_v33 }
 0x294   : > { %6313 = vmatpush3.bf16.msra.mxu0 %v9152_v49 }
 0x295   : > { %6315 = vmatprep.subr.bf16.mxu0 %v9153_v40 }
 0x298   : > { %6317 = vmatpush3.bf16.msra.mxu0 %v9154_v21  ;;  %v5298_v63 = vpop.f32.mrb[16].mxu1 }
 0x299   : > { %6319 = vmatprep.subr.bf16.mxu0 %v8182_v54  ;;  %v5299_v0 = vpop.f32.mrb[17].mxu1 }
 0x29a   : > { %v5300_v48 = vadd.f32 %v5299_v0, %v5298_v63 }
 0x29c   : > { %6321 = vmatpush3.bf16.msra.mxu0 %v9155_v55 }
 0x29d   : > { %6355 = vmatprep.subr.bf16.mxu0 %v9139_v11 }
 0x29f   : > { %3455 = vmatmul.mubr.f32.vlgmr.msra.gmra.mrb[22].mxu0 %v9156_v2 }
 0x2a0   : > { %6357 = vmatpush3.bf16.msra.mxu0 %v9140_v29  ;;  %3661 = vmatprep.mubr.f32.mxu0 %v8107_v31 }
 0x2a1   : > { %6359 = vmatprep.subr.bf16.mxu0 %v9143_v36 }
 0x2a4   : > { %6361 = vmatpush3.bf16.msra.mxu0 %v9144_v9 }
 0x2a5   : > { %6363 = vmatprep.subr.bf16.mxu0 %v9145_v26  ;;  %v9158_v26 = vld [vmem:[#allocation20_spill] sm:$0xff] }
 0x2a8   : > { %6365 = vmatpush3.bf16.msra.mxu0 %v9146_v39  ;;  %v9159_v39 = vld [vmem:[#allocation23_spill] sm:$0xff] }
 0x2a9   : > { %6367 = vmatprep.subr.bf16.mxu0 %v9147_v24 }
 0x2ac   : > { %6369 = vmatpush3.bf16.msra.mxu0 %v9148_v10 }
 0x2ad   : > { %6371 = vmatprep.subr.bf16.mxu0 %v9149_v25 }
 0x2b0   : > { %6373 = vmatpush3.bf16.msra.mxu0 %v9150_v7 }
 0x2b1   : > { %6375 = vmatprep.subr.bf16.mxu0 %v9151_v33 }
 0x2b4   : > { %6377 = vmatpush3.bf16.msra.mxu0 %v9152_v49 }
 0x2b5   : > { %6379 = vmatprep.subr.bf16.mxu0 %v9153_v40 }
 0x2b8   : > { %6381 = vmatpush3.bf16.msra.mxu0 %v9154_v21 }
 0x2b9   : > { %6383 = vmatprep.subr.bf16.mxu0 %v8182_v54  ;;  %v5368_v31 = vpop.f32.mrb[18].mxu1 }
 0x2ba   : > { %v5369_v34 = vpop.f32.mrb[19].mxu1 }
 0x2bb   : > { %v5370_v23 = vadd.f32 %v5369_v34, %v5368_v31 }
 0x2bc   : > { %6385 = vmatpush3.bf16.msra.mxu0 %v9155_v55 }
 0x2bf   : > { %3663 = vmatmul.mubr.f32.vlgmr.msra.gmra.mrb[24].mxu0 %v9128_v44 }
 0x2d2   : > { %v2188_v57 = vpop.f32.mrb[12].mxu0 }
 0x2d3   : > { %2193 = vst.msk [vmem:[%s8596_s26] sm:$0x3] %vm2192_vm3, %v2188_v57  ;;  %v5587_v12 = vpop.f32.mrb[13].mxu0 }
 0x2d9   : > { %v5438_v32 = vpop.f32.mrb[20].mxu1 }
 0x2da   : > { %v5439_v62 = vpop.f32.mrb[21].mxu1 }
 0x2db   : > { %v5440_v56 = vadd.f32 %v5439_v62, %v5438_v32 }
 0x2f2   : > { %v5193_v54 = vpop.f32.mrb[14].mxu0 }
 0x2f3   : > { %v5194_v17 = vpop.f32.mrb[15].mxu0 }
 0x2f4   : > { %v5195_v14 = vadd.f32 %v5194_v17, %v5193_v54 }
 0x2f6   : > { %v2605_v15 = vadd.f32 %v5195_v14, %v8536_v47 }
 0x2f8   : > { %v2711_v8 = vadd.f32 %v5230_v59, %v2605_v15 }
 0x2f9   : > { %v5508_v4 = vpop.f32.mrb[22].mxu1 }
 0x2fa   : > { %v5509_v61 = vpop.f32.mrb[23].mxu1 }
 0x2fb   : > { %v5510_v44 = vadd.f32 %v5509_v61, %v5508_v4 }
 0x312   : > { %v5263_v16 = vpop.f32.mrb[16].mxu0 }
 0x313   : > { %v5264_v43 = vpop.f32.mrb[17].mxu0 }
 0x314   : > { %v5265_v18 = vadd.f32 %v5264_v43, %v5263_v16 }
 0x316   : > { %v2787_v3 = vadd.f32 %v5265_v18, %v2711_v8 }
 0x318   : > { %v2923_v35 = vadd.f32 %v5300_v48, %v2787_v3 }
 0x332   : > { %v5333_v1 = vpop.f32.mrb[18].mxu0 }
 0x333   : > { %v5334_v27 = vpop.f32.mrb[19].mxu0 }
 0x334   : > { %v5335_v30 = vadd.f32 %v5334_v27, %v5333_v1 }
 0x336   : > { %v2995_v51 = vadd.f32 %v5335_v30, %v2923_v35 }
 0x338   : > { %v3075_v45 = vadd.f32 %v5370_v23, %v2995_v51 }
 0x352   : > { %v5403_v41 = vpop.f32.mrb[20].mxu0 }
 0x353   : > { %v5404_v46 = vpop.f32.mrb[21].mxu0 }
 0x354   : > { %v5405_v6 = vadd.f32 %v5404_v46, %v5403_v41 }
 0x356   : > { %v3275_v13 = vadd.f32 %v5405_v6, %v3075_v45 }
 0x358   : > { %v3381_v47 = vadd.f32 %v5440_v56, %v3275_v13 }
 0x372   : > { %v5473_v22 = vpop.f32.mrb[22].mxu0 }
 0x373   : > { %v5474_v28 = vpop.f32.mrb[23].mxu0 }
 0x374   : > { %v5475_v53 = vadd.f32 %v5474_v28, %v5473_v22 }
 0x376   : > { %v3457_v58 = vadd.f32 %v5475_v53, %v3381_v47 }
 0x378   : > { %v3593_v38 = vadd.f32 %v5510_v44, %v3457_v58 }
 0x392   : > { %v5543_v19 = vpop.f32.mrb[24].mxu0 }
 0x393   : > { %v5544_v52 = vpop.f32.mrb[25].mxu0 }
 0x394   : > { %v5545_v50 = vadd.f32 %v5544_v52, %v5543_v19 }
 0x396   : > { %v3665_v42 = vadd.f32 %v5545_v50, %v3593_v38 }
 0x398   : > { %v3668_v11 = vmax.f32 %v3665_v42, 0.0 }
 0x39a   : > { %4361 = vst.msk [vmem:[%s8075_s22 + $0x8] sm:$0xff] %vm1740_vm2, %v3668_v11  ;;  %v3672_v59 = vand.u32 4294901760, %v3668_v11 }
 0x39c   : > { %v3749_v29 = vsub.f32 %v3668_v11, %v3672_v59  ;;  %5589 = vmatpush3.msra.mxu1 %v3672_v59 }
 0x39d   : > { %5591 = vmatmul.mubr.f32.vlgmr.msra.gmra.mrb[24].mxu1 %v9157_v37  ;;  %5593 = vmatprep.subr.mxu1 %v9067_v20 }
 0x39e   : > { %v3750_v5 = vand.u32 4294901760, %v3749_v29  ;;  %5595 = vmatprep.mubr.msk.f32.mxu1 %vm6601_vm0, %v9067_v20 }
 0x3a0   : > { %v3751_v36 = vsub.f32 %v3749_v29, %v3750_v5 }
 0x3a2   : > { %v3752_v9 = vand.u32 4294901760, %v3751_v36 }
 0x3a4   : > { %5594 = vmatpush3.msra.mxu1 %v3752_v9 }
 0x3a5   : > { %5596 = vmatmul.mubr.f32.vlgmr.msra.gmra.mrb[24].mxu1 %v7997_v60  ;;  %5598 = vmatprep.subr.mxu1 %v9067_v20 }
 0x3a6   : > { %5599 = vmatpush3.msra.mxu1 %v3749_v29  ;;  %5600 = vmatprep.mubr.msk.f32.mxu1 %vm6601_vm0, %v9067_v20 }
 0x3a7   : > { %5603 = vmatprep.subr.mxu1 %v9067_v20 }
 0x3ad   : > { %5601 = vmatmul.mubr.f32.vlgmr.msra.gmra.mrb[24].mxu1 %v9158_v26 }
 0x3ae   : > { %5604 = vmatpush3.msra.mxu1 %v3672_v59  ;;  %5605 = vmatprep.mubr.msk.f32.mxu1 %vm6601_vm0, %v9067_v20 }
 0x3af   : > { %5608 = vmatprep.subr.mxu1 %v9067_v20 }
 0x3b5   : > { %5606 = vmatmul.mubr.f32.vlgmr.msra.gmra.mrb[24].mxu1 %v9159_v39 }
 0x3b6   : > { %5609 = vmatpush3.msra.mxu1 %v3750_v5  ;;  %5610 = vmatprep.mubr.msk.f32.mxu1 %vm6601_vm0, %v9067_v20 }
 0x3b7   : > { %5613 = vmatprep.subr.mxu1 %v9067_v20 }
 0x3bd   : > { %5611 = vmatmul.mubr.f32.vlgmr.msra.gmra.mrb[24].mxu1 %v7997_v60 }
 0x3be   : > { %5614 = vmatpush3.msra.mxu1 %v3672_v59  ;;  %5615 = vmatprep.mubr.msk.f32.mxu1 %vm6601_vm0, %v9067_v20 }
 0x3c5   : > { %5616 = vmatmul.mubr.f32.vlgmr.msra.gmra.mrb[24].mxu1 %v7997_v60 }
 0x3c6   : > { %6501 = shalt.err (!%p6498_p5)
}
 0x3c7   : > { %s6502_s13 = scalar_lea.hbm %s8629_s7, 256  ;;  %s6506_s24 = scalar_lea.hbm %s8718_s4, 512 }
 0x3c8   : > { %p6503_p6 = scmp.ne.s32.totalorder %s8629_s7, %s6502_s13  ;;  %p6507_p10 = scmp.lt.u32.totalorder %s8629_s7, %s8718_s4 }
 0x3c9   : > { %p6508_p11 = scmp.lt.u32.totalorder %s6506_s24, %s6502_s13  ;;  %p6510_p13 = scmp.lt.u32.totalorder %s6502_s13, %s8629_s7 }
 0x3ca   : > { %p6504_p7 = pnand %p6503_p6, %p6673_p4 }
 0x3cb   : > { %p6509_p12 = por %p6508_p11, %p6507_p10 }
 0x3cc   : > { %p6505_p9 = pneg %p6504_p7 }
 0x3cd   : > { %p6511_p0 = por %p6510_p13, %p6509_p12 }
 0x3cf   : > { %p6512_p1 = pnand %p6511_p0, %p6505_p9 }
 0x3d1   : > { %6515 = shalt.err (!%p6512_p1)
}
 0x3d2   : > { %s6603_s6 = smov 128   ;;  %s6604_s9 = smov 8  }
 0x3d3   : > { %6407 = dma.vmem_to_hbm [thread:$0]  (%p6673_p4), %s8631_s30, 256, %s8629_s7, %s4125_s8, %s6603_s6, %s6603_s6, %s6604_s9  }
 0x3d4   : > { %s4139_s10 = sshll.u32 %s8596_s26, 4  ;;  %s4373_s11 = sshll.u32 %s6590_s18, 6  ;;  %s8659_s10 = int_to_ptr.vmem [resolvable:$true] %s4139_s10 }
 0x3d5   : > { %s8664_s21 = scalar_lea.hbm %s8717_s3, %s4373_s11  ;;  %s4120_s22 = scalar_lea.sflag [#allocation3], %s8026_s14 }
 0x3d6   : > { %s6516_s24 = scalar_lea.vmem %s8659_s10, 64  ;;  %s6605_s18 = smov [#allocation2]  }
 0x3d7   : > { %p6517_p2 = scmp.ne.s32.totalorder %s8659_s10, %s6516_s24  ;;  %s6520_s30 = sshll.u32 %s6605_s18, 4  ;;  %s6521_s30 = int_to_ptr.vmem [resolvable:$false] %s6520_s30 }
 0x3d8   : > { %s6522_s7 = scalar_lea.vmem %s6521_s30, 128  ;;  %p6523_p6 = scmp.lt.s32.totalorder %s8659_s10, %s6521_s30 }
 0x3d9   : > { %p6518_p3 = pnand %p6517_p2, %p6673_p4  ;;  %p6524_p7 = scmp.lt.s32.totalorder %s6522_s7, %s6516_s24 }
 0x3db   : > { %p6519_p5 = pneg %p6518_p3  ;;  %p6525_p9 = por %p6524_p7, %p6523_p6 }
 0x3dd   : > { %p6526_p10 = pnand %p6525_p9, %p6519_p5 }
 0x498   : > { %v4113_v60 = vpop.f32.mrb[24].mxu1 }
 0x499   : > { %4362 = vst.msk [vmem:[%s8596_s26 + $0x2] sm:$0x3] %vm2192_vm3, %v4113_v60  ;;  %v5617_v20 = vpop.f32.mrb[25].mxu1 }
 0x49a   : > { %6529 = shalt.err (!%p6526_p10)
}
 0x49b   : > { %s6530_s26 = scalar_lea.hbm %s8664_s21, 64  ;;  %s6534_s5 = scalar_lea.hbm %s8717_s3, 128 }
 0x49c   : > { %p6531_p11 = scmp.ne.s32.totalorder %s8664_s21, %s6530_s26  ;;  %p6535_p0 = scmp.lt.u32.totalorder %s8664_s21, %s8717_s3 }
 0x49d   : > { %p6536_p1 = scmp.lt.u32.totalorder %s6534_s5, %s6530_s26  ;;  %p6538_p3 = scmp.lt.u32.totalorder %s6530_s26, %s8664_s21 }
 0x49e   : > { %p6532_p12 = pnand %p6531_p11, %p6673_p4 }
 0x49f   : > { %p6537_p2 = por %p6536_p1, %p6535_p0 }
 0x4a0   : > { %p6533_p13 = pneg %p6532_p12 }
 0x4a1   : > { %p6539_p5 = por %p6538_p3, %p6537_p2 }
 0x4a3   : > { %p6540_p6 = pnand %p6539_p5, %p6533_p13 }
 0x4a5   : > { %6543 = shalt.err (!%p6540_p6)
}
 0x4a6   : > { %s6606_s11 = smov 32   ;;  %s6607_s12 = smov 2  }
 0x4a7   : > { %6406 = dma.vmem_to_hbm [thread:$0]  (%p6673_p4), %s8659_s10, 64, %s8664_s21, %s4120_s22, %s6606_s11, %s6606_s11, %s6607_s12  }
 0x4a8 PF: > { %p6417_p7 = scmp.ge.s32.totalorder %s6598_s20, 2  ;;  %s4171_s13 = sand.u32 1, %s6578_s15  }
 0x4a9   : > { %s4172_s24 = scalar_lea.sflag [#allocation3], %s4171_s13 }
 0x4aa   : > { %p6411_p9 = pnand %p6417_p7, %p6680_p8 }
 0x4ac   : > { %6569 = dma.done.wait (!%p6411_p9), %s4172_s24, 64  }
 0x4ad   : > { %6571 = vsyncadd (!%p6411_p9), %s4172_s24, 4294967232  ;;  %s4181_s18 = scalar_lea.sflag [#allocation5], %s4171_s13 }
 0x4ae   : > { %6573 = dma.done.wait (!%p6411_p9), %s4181_s18, 256  }
 0x4af   : > { %6575 = vsyncadd (!%p6411_p9), %s4181_s18, 4294967040  ;;  %s21_s20 = sadd.s32 1, %s6598_s20   ;;  %s9160_s15 = smov %s6582_s16 }
 0x4b0   : > { %p18_p10 = scmp.ge.s32.totalorder %s21_s20, 4   ;;  %s9161_s16 = smov %s6586_s17 }
 0x4b1   : > { %s9162_s17 = smov %s6686_s28  ;;  %s9163_s18 = smov %s6594_s19 }
 0x4b2   : > { %s9164_s19 = smov %s9166_s23  ;;  %20 = sbr.rel (!%p18_p10) target bundleno = 6 (0x6), region = 91 }
 0x4b9   :  { %4186 = vsyncpa [#allocation3], 1 }
 0x4ba   :  { %4188 = vsyncpa [#allocation3 + $0x1], 1 }
 0x4bb   :  { %4189 = vsyncpa [#allocation5], 1 }
 0x4bc   :  { %4191 = vsyncpa [#allocation5 + $0x1], 1 }

</bundles_post_ra>
